<compile_context>
chip_gen: v5e
topology: v5e:2x2
jax: 0.10.0
libtpu: 0.0.40
codegen_flags: <defaults>
</compile_context>

<pallas_src>
import functools
import math

import jax
import jax.numpy as jnp
from jax.experimental import pallas as pl
from jax.experimental.pallas import tpu as pltpu


NEG_INF = -1e30  # additive-mask value; safe in the f32 score / bf16 exp paths


def _temporal_attention_kernel(x_ref, wqkv_ref, wproj_ref, bproj_ref, o_ref,
                               *, heads, window, causal, exp_dtype):
    # x_ref:     (M, C)   bf16 rows; M = (M // window) windows of length `window`
    # wqkv_ref:  (C, 3C)  bf16 qkv weight (transposed); qk scale folded into Q cols
    # wproj_ref: (C, C)   bf16 proj weight (transposed)
    # bproj_ref: (1, C)   f32 proj bias
    # o_ref:     (M, C)   x.dtype output
    X = x_ref[...]
    M, C = X.shape
    hd = C // heads

    # ---- block-diagonal (+causal) keep-mask, rebuilt per step --------------
    # Division-free window-id: accumulate (index >= k*window) over the few
    # window boundaries inside the block (adaptive M keeps M/window small).
    r = jax.lax.broadcasted_iota(jnp.int32, (M, M), 0)
    c = jax.lax.broadcasted_iota(jnp.int32, (M, M), 1)
    if window == 1:
        keep = r == c
    else:
        wid_r = jnp.zeros((M, M), jnp.int32)
        wid_c = jnp.zeros((M, M), jnp.int32)
        for k in range(1, M // window):
            b = k * window
            wid_r = wid_r + (r >= b).astype(jnp.int32)
            wid_c = wid_c + (c >= b).astype(jnp.int32)
        keep = wid_r == wid_c
        if causal:
            keep = keep & (r >= c)

    # ---- fused QKV projection (bf16 MXU operands, f32 accumulation) --------
    qkv = jnp.dot(X, wqkv_ref[...],
                  preferred_element_type=jnp.float32)        # (M, 3C) f32
    qkv = qkv.astype(jnp.bfloat16)                           # MXU-operand dtype
    # TODO(synk): if a bundle dump shows lane-relayout / spill pressure from
    # the 32-lane head slices below, pre-slice the weights per head in the
    # wrapper and do (M,C)@(C,hd) matmuls instead (trades MXU slack for fewer
    # XLU/ld-st ops); keep the fused matmul until the bundle says otherwise.

    out_acc = None
    for h in range(heads):                                   # heads is small: unroll
        qh = qkv[:, h * hd:(h + 1) * hd]                     # (M, hd) bf16 (pre-scaled)
        kh = qkv[:, C + h * hd:C + (h + 1) * hd]             # (M, hd) bf16
        vh = qkv[:, 2 * C + h * hd:2 * C + (h + 1) * hd]     # (M, hd) bf16

        # Dense scores over the block; masked entries -> large negative (f32).
        s = jax.lax.dot_general(qh, kh, (((1,), (1,)), ((), ())),
                                preferred_element_type=jnp.float32)
        s = jnp.where(keep, s, NEG_INF)                      # (M, M) f32
        m = jnp.max(s, axis=-1, keepdims=True)
        # exp in bf16 on bf16-EUP generations (v6e/v7x); f32 elsewhere (v5e).
        e = jnp.exp((s - m).astype(exp_dtype))
        l = jnp.sum(e.astype(jnp.float32), axis=-1, keepdims=True)   # >= 1

        # Unnormalized PV matmul, then per-row scale of the (M, hd) result
        # with the EUP approx reciprocal (cheaper than normalizing (M, M) p).
        oh = jnp.dot(e.astype(jnp.bfloat16), vh,
                     preferred_element_type=jnp.float32)     # (M, hd) f32
        oh = oh * pl.reciprocal(l, approx=True)

        # concat_h(oh) @ Wproj == sum_h oh @ Wproj[h*hd:(h+1)*hd, :]
        ph = jnp.dot(oh.astype(jnp.bfloat16),
                     wproj_ref[h * hd:(h + 1) * hd, :],
                     preferred_element_type=jnp.float32)     # (M, C) f32
        out_acc = ph if out_acc is None else out_acc + ph

    o_ref[...] = (out_acc + bproj_ref[...]).astype(o_ref.dtype)


def temporal_attention(x, wqkv, wproj, bproj, *, heads=2, window_size=1,
                       qk_scale=None, causal=True, block_rows=128,
                       bf16_exp=None):
    """x: (B_prev, T_prev, C). wqkv: (3C, C), wproj: (C, C), bproj: (C,)
    (PyTorch nn.Linear layouts).  block_rows is the upper bound on rows per
    grid step (128 works on all generations; 256 only pays off on v6e/v7x
    when window_size >= ~32).  bf16_exp=None auto-detects v6e/v7x."""
    B_prev, T_prev, C = x.shape
    assert C % heads == 0
    hd = C // heads
    scale = qk_scale if qk_scale is not None else hd ** (-0.5)

    # window length (window_size <= 0 => attend over the full T_prev sequence)
    W = window_size if window_size > 0 else T_prev
    total = B_prev * T_prev
    assert total % W == 0, "window_size must divide B_prev * T_prev"

    # Rows per grid step: multiple of W (windows never straddle a block) and of
    # 8 (sublane tiling).  Wasted exp/score work of the dense (M, M) block is
    # ~M/W, so cap M at ~8 windows for small W; large W fills up to block_rows.
    m0 = (W * 8) // math.gcd(W, 8)
    target = min(block_rows, max(m0, 8 * W))
    M = m0 * max(1, target // m0)
    # TODO(synk): for window_size <= 0 with long sequences (W >= ~256), switch
    # to a flash-style KV-tiled inner loop; the dense (M, M) scores grow
    # quadratically and blow vreg/VMEM budgets (v7x's 64 MiB VMEM first).

    # ---- wrapper-side glue: flatten rows, pad, prep weights ----------------
    x_flat = x.reshape(total, C)
    pad = (-total) % M
    if pad:
        x_flat = jnp.concatenate(
            [x_flat, jnp.zeros((pad, C), x_flat.dtype)], axis=0)
    R = total + pad
    grid = R // M

    # bf16 MXU operands (fold the qk scale into the Q columns in f32 first).
    x_in = x_flat.astype(jnp.bfloat16)
    wqkv_t = wqkv.T.astype(jnp.float32)
    wqkv_t = wqkv_t.at[:, :C].multiply(scale)
    wqkv_t = wqkv_t.astype(jnp.bfloat16)                     # (C, 3C)
    wproj_t = wproj.T.astype(jnp.bfloat16)                   # (C, C)
    bproj_2d = bproj.reshape(1, C).astype(jnp.float32)

    # bf16 exp only where the EUP is bf16-native (v6e / v7x); v5e keeps all
    # elementwise math in f32 (no bf16 VPU/EUP there).
    if bf16_exp is None:
        kind = jax.devices()[0].device_kind.lower()
        bf16_exp = any(tag in kind for tag in ("v6", "v7", "7x"))
    exp_dtype = jnp.bfloat16 if bf16_exp else jnp.float32

    kernel = functools.partial(_temporal_attention_kernel, heads=heads,
                               window=W, causal=causal, exp_dtype=exp_dtype)

    # Advisory cost estimate so XLA can overlap surrounding ops.
    flops = grid * (2 * M * C * 3 * C            # QKV projection
                    + heads * 4 * M * M * hd     # scores + PV
                    + 2 * M * C * C)             # output projection
    transcendentals = grid * heads * M * M
    bytes_accessed = (R * C * (2 + x.dtype.itemsize)          # x (bf16) + out
                      + (3 * C * C + C * C) * 2 + 4 * C)      # weights + bias
    cost = pl.CostEstimate(flops=flops, transcendentals=transcendentals,
                           bytes_accessed=bytes_accessed)

    # Resident operands (constant index_map) are fetched once; single-buffer
    # them to halve their VMEM cost (matters for large C on v7x).
    resident = dict(pipeline_mode=pl.Buffered(1))

    out_flat = pl.pallas_call(
        kernel,
        out_shape=jax.ShapeDtypeStruct((R, C), x.dtype),
        grid_spec=pltpu.PrefetchScalarGridSpec(
            num_scalar_prefetch=0,
            grid=(grid,),
            in_specs=[
                pl.BlockSpec((M, C), lambda i: (i, 0)),                  # x rows
                pl.BlockSpec((C, 3 * C), lambda i: (0, 0), **resident),  # Wqkv^T
                pl.BlockSpec((C, C), lambda i: (0, 0), **resident),      # Wproj^T
                pl.BlockSpec((1, C), lambda i: (0, 0), **resident),      # proj bias
            ],
            out_specs=pl.BlockSpec((M, C), lambda i: (i, 0)),
        ),
        compiler_params=pltpu.CompilerParams(
            dimension_semantics=("parallel",)),              # shard across TCs (v7x)
        cost_estimate=cost,
    )(x_in, wqkv_t, wproj_t, bproj_2d)

    return out_flat[:total].reshape(B_prev, T_prev, C)


def _reference(x, wqkv, wproj, bproj, *, heads, window_size, causal):
    """Pure-jnp f32 reference mirroring the PyTorch forward, for verification."""
    B_prev, T_prev, C = x.shape
    hd = C // heads
    scale = hd ** (-0.5)
    xw = x.reshape(-1, window_size, C)
    B, T, _ = xw.shape
    qkv = (xw @ wqkv.T).reshape(B, T, 3, heads, hd).transpose(2, 0, 3, 1, 4)
    q, k, v = qkv[0], qkv[1], qkv[2]                          # (B, H, T, hd)
    attn = jnp.einsum('bhqd,bhkd->bhqk', q, k) * scale
    if causal:
        m = jnp.tril(jnp.ones((window_size, window_size)))
        attn = jnp.where(m == 0, -jnp.inf, attn)
    p = jax.nn.softmax(attn, axis=-1)
    o = jnp.einsum('bhqk,bhkd->bhqd', p, v).transpose(0, 2, 1, 3).reshape(B, T, C)
    o = o @ wproj.T + bproj
    return o.reshape(B_prev, T_prev, C)


if __name__ == "__main__":
    # Small shapes consistent with the module's forward:
    #   x: (B_prev, T_prev, C); window_size divides B_prev * T_prev.
    # C=128 keeps I/O blocks lane-dense; 512 rows with W=8 -> M=64 -> 8 grid
    # steps (>= 4 per TensorCore on v7x).
    B_prev, T_prev, C = 8, 64, 128
    heads, window_size = 4, 8

    key = jax.random.PRNGKey(0)
    kx, kqkv, kproj, kb = jax.random.split(key, 4)
    x = jax.random.normal(kx, (B_prev, T_prev, C), dtype=jnp.float32)
    # nn.Linear(dim, dim*3, bias=False): weight (3C, C)
    wqkv = jax.random.normal(kqkv, (3 * C, C), dtype=jnp.float32) * 0.05
    # nn.Linear(dim, dim): weight (C, C), bias (C,)
    wproj = jax.random.normal(kproj, (C, C), dtype=jnp.float32) * 0.05
    bproj = jax.random.normal(kb, (C,), dtype=jnp.float32) * 0.05

    out = temporal_attention(x, wqkv, wproj, bproj,
                             heads=heads, window_size=window_size, causal=True)
    out = jax.block_until_ready(out)

    ref = _reference(x, wqkv, wproj, bproj,
                     heads=heads, window_size=window_size, causal=True)
    assert out.shape == (B_prev, T_prev, C)
    # Tolerances reflect bf16 MXU operands (and possibly bf16 exp) vs an f32
    # reference; structural bugs (mask / head / window errors) are O(0.1-1).
    err = jnp.abs(out - ref)
    assert jnp.allclose(out, ref, atol=4e-2, rtol=4e-2), "mismatch vs reference"
    assert float(jnp.mean(err)) < 1e-2, "mean error too large vs reference"

    # TODO(synk): dropout (attn_drop / proj_drop) is identity at p=0.0 and is
    # therefore omitted (inference semantics).
    print("KERNEL_OK")
</pallas_src>

<mosaic_0001>
module attributes {stable_mosaic.version = 11 : i64} {
  func.func @_temporal_attention_kernel(%arg0: i32, %arg1: memref<64x128xbf16, #tpu.memory_space<vmem>>, %arg2: memref<128x384xbf16, #tpu.memory_space<vmem>>, %arg3: memref<128x128xbf16, #tpu.memory_space<vmem>>, %arg4: memref<1x128xf32, #tpu.memory_space<vmem>>, %arg5: memref<64x128xf32, #tpu.memory_space<vmem>>) attributes {dimension_semantics = [#tpu.dimension_semantics<parallel>], iteration_bounds = array<i64: 8>, scalar_prefetch = 0 : i64, scratch_operands = 0 : i64, tpu.core_type = #tpu.core_type<tc>, window_params = [{transform_indices = @transform_0, window_bounds = array<i64: 64, 128>}, {pipeline_mode = #tpu.pipeline_mode<synchronous>, transform_indices = @transform_1, window_bounds = array<i64: 128, 384>}, {pipeline_mode = #tpu.pipeline_mode<synchronous>, transform_indices = @transform_2, window_bounds = array<i64: 128, 128>}, {pipeline_mode = #tpu.pipeline_mode<synchronous>, transform_indices = @transform_3, window_bounds = array<i64: 1, 128>}, {transform_indices = @transform_4, window_bounds = array<i64: 64, 128>}]} {
    %c0 = arith.constant 0 : index
    %c0_0 = arith.constant 0 : index
    %0 = vector.load %arg1[%c0, %c0_0] : memref<64x128xbf16, #tpu.memory_space<vmem>>, vector<64x128xbf16>
    %1 = tpu.iota {dimensions = array<i32: 0>} : vector<64x64xi32>
    %2 = tpu.iota {dimensions = array<i32: 1>} : vector<64x64xi32>
    %c0_i32 = arith.constant 0 : i32
    %3 = vector.broadcast %c0_i32 : i32 to vector<64x64xi32>
    %c0_i32_1 = arith.constant 0 : i32
    %4 = vector.broadcast %c0_i32_1 : i32 to vector<64x64xi32>
    %c8_i32 = arith.constant 8 : i32
    %5 = vector.broadcast %c8_i32 : i32 to vector<64x64xi32>
    %6 = arith.cmpi sge, %1, %5 : vector<64x64xi32>
    %7 = arith.extui %6 : vector<64x64xi1> to vector<64x64xi32>
    %8 = arith.addi %3, %7 : vector<64x64xi32>
    %c8_i32_2 = arith.constant 8 : i32
    %9 = vector.broadcast %c8_i32_2 : i32 to vector<64x64xi32>
    %10 = arith.cmpi sge, %2, %9 : vector<64x64xi32>
    %11 = arith.extui %10 : vector<64x64xi1> to vector<64x64xi32>
    %12 = arith.addi %4, %11 : vector<64x64xi32>
    %c16_i32 = arith.constant 16 : i32
    %13 = vector.broadcast %c16_i32 : i32 to vector<64x64xi32>
    %14 = arith.cmpi sge, %1, %13 : vector<64x64xi32>
    %15 = arith.extui %14 : vector<64x64xi1> to vector<64x64xi32>
    %16 = arith.addi %8, %15 : vector<64x64xi32>
    %c16_i32_3 = arith.constant 16 : i32
    %17 = vector.broadcast %c16_i32_3 : i32 to vector<64x64xi32>
    %18 = arith.cmpi sge, %2, %17 : vector<64x64xi32>
    %19 = arith.extui %18 : vector<64x64xi1> to vector<64x64xi32>
    %20 = arith.addi %12, %19 : vector<64x64xi32>
    %c24_i32 = arith.constant 24 : i32
    %21 = vector.broadcast %c24_i32 : i32 to vector<64x64xi32>
    %22 = arith.cmpi sge, %1, %21 : vector<64x64xi32>
    %23 = arith.extui %22 : vector<64x64xi1> to vector<64x64xi32>
    %24 = arith.addi %16, %23 : vector<64x64xi32>
    %c24_i32_4 = arith.constant 24 : i32
    %25 = vector.broadcast %c24_i32_4 : i32 to vector<64x64xi32>
    %26 = arith.cmpi sge, %2, %25 : vector<64x64xi32>
    %27 = arith.extui %26 : vector<64x64xi1> to vector<64x64xi32>
    %28 = arith.addi %20, %27 : vector<64x64xi32>
    %c32_i32 = arith.constant 32 : i32
    %29 = vector.broadcast %c32_i32 : i32 to vector<64x64xi32>
    %30 = arith.cmpi sge, %1, %29 : vector<64x64xi32>
    %31 = arith.extui %30 : vector<64x64xi1> to vector<64x64xi32>
    %32 = arith.addi %24, %31 : vector<64x64xi32>
    %c32_i32_5 = arith.constant 32 : i32
    %33 = vector.broadcast %c32_i32_5 : i32 to vector<64x64xi32>
    %34 = arith.cmpi sge, %2, %33 : vector<64x64xi32>
    %35 = arith.extui %34 : vector<64x64xi1> to vector<64x64xi32>
    %36 = arith.addi %28, %35 : vector<64x64xi32>
    %c40_i32 = arith.constant 40 : i32
    %37 = vector.broadcast %c40_i32 : i32 to vector<64x64xi32>
    %38 = arith.cmpi sge, %1, %37 : vector<64x64xi32>
    %39 = arith.extui %38 : vector<64x64xi1> to vector<64x64xi32>
    %40 = arith.addi %32, %39 : vector<64x64xi32>
    %c40_i32_6 = arith.constant 40 : i32
    %41 = vector.broadcast %c40_i32_6 : i32 to vector<64x64xi32>
    %42 = arith.cmpi sge, %2, %41 : vector<64x64xi32>
    %43 = arith.extui %42 : vector<64x64xi1> to vector<64x64xi32>
    %44 = arith.addi %36, %43 : vector<64x64xi32>
    %c48_i32 = arith.constant 48 : i32
    %45 = vector.broadcast %c48_i32 : i32 to vector<64x64xi32>
    %46 = arith.cmpi sge, %1, %45 : vector<64x64xi32>
    %47 = arith.extui %46 : vector<64x64xi1> to vector<64x64xi32>
    %48 = arith.addi %40, %47 : vector<64x64xi32>
    %c48_i32_7 = arith.constant 48 : i32
    %49 = vector.broadcast %c48_i32_7 : i32 to vector<64x64xi32>
    %50 = arith.cmpi sge, %2, %49 : vector<64x64xi32>
    %51 = arith.extui %50 : vector<64x64xi1> to vector<64x64xi32>
    %52 = arith.addi %44, %51 : vector<64x64xi32>
    %c56_i32 = arith.constant 56 : i32
    %53 = vector.broadcast %c56_i32 : i32 to vector<64x64xi32>
    %54 = arith.cmpi sge, %1, %53 : vector<64x64xi32>
    %55 = arith.extui %54 : vector<64x64xi1> to vector<64x64xi32>
    %56 = arith.addi %48, %55 : vector<64x64xi32>
    %c56_i32_8 = arith.constant 56 : i32
    %57 = vector.broadcast %c56_i32_8 : i32 to vector<64x64xi32>
    %58 = arith.cmpi sge, %2, %57 : vector<64x64xi32>
    %59 = arith.extui %58 : vector<64x64xi1> to vector<64x64xi32>
    %60 = arith.addi %52, %59 : vector<64x64xi32>
    %61 = arith.cmpi eq, %56, %60 : vector<64x64xi32>
    %62 = arith.cmpi sge, %1, %2 : vector<64x64xi32>
    %63 = arith.andi %61, %62 : vector<64x64xi1>
    %c0_9 = arith.constant 0 : index
    %c0_10 = arith.constant 0 : index
    %64 = vector.load %arg2[%c0_9, %c0_10] : memref<128x384xbf16, #tpu.memory_space<vmem>>, vector<128x384xbf16>
    %cst = arith.constant dense<0.000000e+00> : vector<64x384xf32>
    %65 = tpu.matmul %0, %64, %cst {dimension_numbers = #tpu.dot_dimension_numbers<[1], [0], [0], [1], [0, 0, 1, 1], [], []>} : vector<64x128xbf16>, vector<128x384xbf16>, vector<64x384xf32> -> vector<64x384xf32>
    %66 = arith.truncf %65 : vector<64x384xf32> to vector<64x384xbf16>
    %67 = vector.extract_strided_slice %66 {offsets = [0, 0], sizes = [64, 32], strides = [1, 1]} : vector<64x384xbf16> to vector<64x32xbf16>
    %68 = vector.extract_strided_slice %66 {offsets = [0, 128], sizes = [64, 32], strides = [1, 1]} : vector<64x384xbf16> to vector<64x32xbf16>
    %69 = vector.extract_strided_slice %66 {offsets = [0, 256], sizes = [64, 32], strides = [1, 1]} : vector<64x384xbf16> to vector<64x32xbf16>
    %cst_11 = arith.constant dense<0.000000e+00> : vector<64x64xf32>
    %70 = tpu.matmul %67, %68, %cst_11 {dimension_numbers = #tpu.dot_dimension_numbers<[1], [1], [0], [0], [0, 0, 1, 0], [], []>} : vector<64x32xbf16>, vector<64x32xbf16>, vector<64x64xf32> -> vector<64x64xf32>
    %cst_12 = arith.constant -1.000000e+30 : f32
    %71 = vector.broadcast %cst_12 : f32 to vector<64x64xf32>
    %72 = arith.select %63, %70, %71 : vector<64x64xi1>, vector<64x64xf32>
    %cst_13 = arith.constant dense<0xFF800000> : vector<64xf32>
    %73 = vector.multi_reduction <maximumf>, %72, %cst_13 [1] : vector<64x64xf32> to vector<64xf32>
    %74 = vector.shape_cast %73 : vector<64xf32> to vector<64x1xf32>
    %75 = vector.broadcast %74 : vector<64x1xf32> to vector<64x64xf32>
    %76 = arith.subf %72, %75 : vector<64x64xf32>
    %77 = math.exp %76 : vector<64x64xf32>
    %cst_14 = arith.constant dense<0.000000e+00> : vector<64xf32>
    %78 = vector.multi_reduction <add>, %77, %cst_14 [1] : vector<64x64xf32> to vector<64xf32>
    %79 = vector.shape_cast %78 : vector<64xf32> to vector<64x1xf32>
    %80 = arith.truncf %77 : vector<64x64xf32> to vector<64x64xbf16>
    %cst_15 = arith.constant dense<0.000000e+00> : vector<64x32xf32>
    %81 = tpu.matmul %80, %69, %cst_15 {dimension_numbers = #tpu.dot_dimension_numbers<[1], [0], [0], [1], [0, 0, 1, 1], [], []>} : vector<64x64xbf16>, vector<64x32xbf16>, vector<64x32xf32> -> vector<64x32xf32>
    %82 = tpu.reciprocal %79 {approx = true} : vector<64x1xf32> -> vector<64x1xf32>
    %83 = vector.broadcast %82 : vector<64x1xf32> to vector<64x32xf32>
    %84 = arith.mulf %81, %83 : vector<64x32xf32>
    %85 = arith.truncf %84 : vector<64x32xf32> to vector<64x32xbf16>
    %c0_16 = arith.constant 0 : index
    %c0_17 = arith.constant 0 : index
    %86 = vector.load %arg3[%c0_16, %c0_17] : memref<128x128xbf16, #tpu.memory_space<vmem>>, vector<32x128xbf16>
    %cst_18 = arith.constant dense<0.000000e+00> : vector<64x128xf32>
    %87 = tpu.matmul %85, %86, %cst_18 {dimension_numbers = #tpu.dot_dimension_numbers<[1], [0], [0], [1], [0, 0, 1, 1], [], []>} : vector<64x32xbf16>, vector<32x128xbf16>, vector<64x128xf32> -> vector<64x128xf32>
    %88 = vector.extract_strided_slice %66 {offsets = [0, 32], sizes = [64, 32], strides = [1, 1]} : vector<64x384xbf16> to vector<64x32xbf16>
    %89 = vector.extract_strided_slice %66 {offsets = [0, 160], sizes = [64, 32], strides = [1, 1]} : vector<64x384xbf16> to vector<64x32xbf16>
    %90 = vector.extract_strided_slice %66 {offsets = [0, 288], sizes = [64, 32], strides = [1, 1]} : vector<64x384xbf16> to vector<64x32xbf16>
    %cst_19 = arith.constant dense<0.000000e+00> : vector<64x64xf32>
    %91 = tpu.matmul %88, %89, %cst_19 {dimension_numbers = #tpu.dot_dimension_numbers<[1], [1], [0], [0], [0, 0, 1, 0], [], []>} : vector<64x32xbf16>, vector<64x32xbf16>, vector<64x64xf32> -> vector<64x64xf32>
    %cst_20 = arith.constant -1.000000e+30 : f32
    %92 = vector.broadcast %cst_20 : f32 to vector<64x64xf32>
    %93 = arith.select %63, %91, %92 : vector<64x64xi1>, vector<64x64xf32>
    %cst_21 = arith.constant dense<0xFF800000> : vector<64xf32>
    %94 = vector.multi_reduction <maximumf>, %93, %cst_21 [1] : vector<64x64xf32> to vector<64xf32>
    %95 = vector.shape_cast %94 : vector<64xf32> to vector<64x1xf32>
    %96 = vector.broadcast %95 : vector<64x1xf32> to vector<64x64xf32>
    %97 = arith.subf %93, %96 : vector<64x64xf32>
    %98 = math.exp %97 : vector<64x64xf32>
    %cst_22 = arith.constant dense<0.000000e+00> : vector<64xf32>
    %99 = vector.multi_reduction <add>, %98, %cst_22 [1] : vector<64x64xf32> to vector<64xf32>
    %100 = vector.shape_cast %99 : vector<64xf32> to vector<64x1xf32>
    %101 = arith.truncf %98 : vector<64x64xf32> to vector<64x64xbf16>
    %cst_23 = arith.constant dense<0.000000e+00> : vector<64x32xf32>
    %102 = tpu.matmul %101, %90, %cst_23 {dimension_numbers = #tpu.dot_dimension_numbers<[1], [0], [0], [1], [0, 0, 1, 1], [], []>} : vector<64x64xbf16>, vector<64x32xbf16>, vector<64x32xf32> -> vector<64x32xf32>
    %103 = tpu.reciprocal %100 {approx = true} : vector<64x1xf32> -> vector<64x1xf32>
    %104 = vector.broadcast %103 : vector<64x1xf32> to vector<64x32xf32>
    %105 = arith.mulf %102, %104 : vector<64x32xf32>
    %106 = arith.truncf %105 : vector<64x32xf32> to vector<64x32xbf16>
    %c32 = arith.constant 32 : index
    %c0_24 = arith.constant 0 : index
    %107 = vector.load %arg3[%c32, %c0_24] : memref<128x128xbf16, #tpu.memory_space<vmem>>, vector<32x128xbf16>
    %cst_25 = arith.constant dense<0.000000e+00> : vector<64x128xf32>
    %108 = tpu.matmul %106, %107, %cst_25 {dimension_numbers = #tpu.dot_dimension_numbers<[1], [0], [0], [1], [0, 0, 1, 1], [], []>} : vector<64x32xbf16>, vector<32x128xbf16>, vector<64x128xf32> -> vector<64x128xf32>
    %109 = arith.addf %87, %108 : vector<64x128xf32>
    %110 = vector.extract_strided_slice %66 {offsets = [0, 64], sizes = [64, 32], strides = [1, 1]} : vector<64x384xbf16> to vector<64x32xbf16>
    %111 = vector.extract_strided_slice %66 {offsets = [0, 192], sizes = [64, 32], strides = [1, 1]} : vector<64x384xbf16> to vector<64x32xbf16>
    %112 = vector.extract_strided_slice %66 {offsets = [0, 320], sizes = [64, 32], strides = [1, 1]} : vector<64x384xbf16> to vector<64x32xbf16>
    %cst_26 = arith.constant dense<0.000000e+00> : vector<64x64xf32>
    %113 = tpu.matmul %110, %111, %cst_26 {dimension_numbers = #tpu.dot_dimension_numbers<[1], [1], [0], [0], [0, 0, 1, 0], [], []>} : vector<64x32xbf16>, vector<64x32xbf16>, vector<64x64xf32> -> vector<64x64xf32>
    %cst_27 = arith.constant -1.000000e+30 : f32
    %114 = vector.broadcast %cst_27 : f32 to vector<64x64xf32>
    %115 = arith.select %63, %113, %114 : vector<64x64xi1>, vector<64x64xf32>
    %cst_28 = arith.constant dense<0xFF800000> : vector<64xf32>
    %116 = vector.multi_reduction <maximumf>, %115, %cst_28 [1] : vector<64x64xf32> to vector<64xf32>
    %117 = vector.shape_cast %116 : vector<64xf32> to vector<64x1xf32>
    %118 = vector.broadcast %117 : vector<64x1xf32> to vector<64x64xf32>
    %119 = arith.subf %115, %118 : vector<64x64xf32>
    %120 = math.exp %119 : vector<64x64xf32>
    %cst_29 = arith.constant dense<0.000000e+00> : vector<64xf32>
    %121 = vector.multi_reduction <add>, %120, %cst_29 [1] : vector<64x64xf32> to vector<64xf32>
    %122 = vector.shape_cast %121 : vector<64xf32> to vector<64x1xf32>
    %123 = arith.truncf %120 : vector<64x64xf32> to vector<64x64xbf16>
    %cst_30 = arith.constant dense<0.000000e+00> : vector<64x32xf32>
    %124 = tpu.matmul %123, %112, %cst_30 {dimension_numbers = #tpu.dot_dimension_numbers<[1], [0], [0], [1], [0, 0, 1, 1], [], []>} : vector<64x64xbf16>, vector<64x32xbf16>, vector<64x32xf32> -> vector<64x32xf32>
    %125 = tpu.reciprocal %122 {approx = true} : vector<64x1xf32> -> vector<64x1xf32>
    %126 = vector.broadcast %125 : vector<64x1xf32> to vector<64x32xf32>
    %127 = arith.mulf %124, %126 : vector<64x32xf32>
    %128 = arith.truncf %127 : vector<64x32xf32> to vector<64x32xbf16>
    %c64 = arith.constant 64 : index
    %c0_31 = arith.constant 0 : index
    %129 = vector.load %arg3[%c64, %c0_31] : memref<128x128xbf16, #tpu.memory_space<vmem>>, vector<32x128xbf16>
    %cst_32 = arith.constant dense<0.000000e+00> : vector<64x128xf32>
    %130 = tpu.matmul %128, %129, %cst_32 {dimension_numbers = #tpu.dot_dimension_numbers<[1], [0], [0], [1], [0, 0, 1, 1], [], []>} : vector<64x32xbf16>, vector<32x128xbf16>, vector<64x128xf32> -> vector<64x128xf32>
    %131 = arith.addf %109, %130 : vector<64x128xf32>
    %132 = vector.extract_strided_slice %66 {offsets = [0, 96], sizes = [64, 32], strides = [1, 1]} : vector<64x384xbf16> to vector<64x32xbf16>
    %133 = vector.extract_strided_slice %66 {offsets = [0, 224], sizes = [64, 32], strides = [1, 1]} : vector<64x384xbf16> to vector<64x32xbf16>
    %134 = vector.extract_strided_slice %66 {offsets = [0, 352], sizes = [64, 32], strides = [1, 1]} : vector<64x384xbf16> to vector<64x32xbf16>
    %cst_33 = arith.constant dense<0.000000e+00> : vector<64x64xf32>
    %135 = tpu.matmul %132, %133, %cst_33 {dimension_numbers = #tpu.dot_dimension_numbers<[1], [1], [0], [0], [0, 0, 1, 0], [], []>} : vector<64x32xbf16>, vector<64x32xbf16>, vector<64x64xf32> -> vector<64x64xf32>
    %cst_34 = arith.constant -1.000000e+30 : f32
    %136 = vector.broadcast %cst_34 : f32 to vector<64x64xf32>
    %137 = arith.select %63, %135, %136 : vector<64x64xi1>, vector<64x64xf32>
    %cst_35 = arith.constant dense<0xFF800000> : vector<64xf32>
    %138 = vector.multi_reduction <maximumf>, %137, %cst_35 [1] : vector<64x64xf32> to vector<64xf32>
    %139 = vector.shape_cast %138 : vector<64xf32> to vector<64x1xf32>
    %140 = vector.broadcast %139 : vector<64x1xf32> to vector<64x64xf32>
    %141 = arith.subf %137, %140 : vector<64x64xf32>
    %142 = math.exp %141 : vector<64x64xf32>
    %cst_36 = arith.constant dense<0.000000e+00> : vector<64xf32>
    %143 = vector.multi_reduction <add>, %142, %cst_36 [1] : vector<64x64xf32> to vector<64xf32>
    %144 = vector.shape_cast %143 : vector<64xf32> to vector<64x1xf32>
    %145 = arith.truncf %142 : vector<64x64xf32> to vector<64x64xbf16>
    %cst_37 = arith.constant dense<0.000000e+00> : vector<64x32xf32>
    %146 = tpu.matmul %145, %134, %cst_37 {dimension_numbers = #tpu.dot_dimension_numbers<[1], [0], [0], [1], [0, 0, 1, 1], [], []>} : vector<64x64xbf16>, vector<64x32xbf16>, vector<64x32xf32> -> vector<64x32xf32>
    %147 = tpu.reciprocal %144 {approx = true} : vector<64x1xf32> -> vector<64x1xf32>
    %148 = vector.broadcast %147 : vector<64x1xf32> to vector<64x32xf32>
    %149 = arith.mulf %146, %148 : vector<64x32xf32>
    %150 = arith.truncf %149 : vector<64x32xf32> to vector<64x32xbf16>
    %c96 = arith.constant 96 : index
    %c0_38 = arith.constant 0 : index
    %151 = vector.load %arg3[%c96, %c0_38] : memref<128x128xbf16, #tpu.memory_space<vmem>>, vector<32x128xbf16>
    %cst_39 = arith.constant dense<0.000000e+00> : vector<64x128xf32>
    %152 = tpu.matmul %150, %151, %cst_39 {dimension_numbers = #tpu.dot_dimension_numbers<[1], [0], [0], [1], [0, 0, 1, 1], [], []>} : vector<64x32xbf16>, vector<32x128xbf16>, vector<64x128xf32> -> vector<64x128xf32>
    %153 = arith.addf %131, %152 : vector<64x128xf32>
    %c0_40 = arith.constant 0 : index
    %c0_41 = arith.constant 0 : index
    %154 = vector.load %arg4[%c0_40, %c0_41] : memref<1x128xf32, #tpu.memory_space<vmem>>, vector<1x128xf32>
    %155 = vector.broadcast %154 : vector<1x128xf32> to vector<64x128xf32>
    %156 = arith.addf %153, %155 : vector<64x128xf32>
    %c0_42 = arith.constant 0 : index
    %c0_43 = arith.constant 0 : index
    %157 = vector.load %arg5[%c0_42, %c0_43] : memref<64x128xf32, #tpu.memory_space<vmem>>, vector<64x128xf32>
    tpu.vector_store %arg5[%c0_42, %c0_43], %156 {strides = array<i32>} : memref<64x128xf32, #tpu.memory_space<vmem>>, vector<64x128xf32>,
    return
  }
  func.func @transform_0(%arg0: i32) -> (i32, i32) {
    %c0_i32 = arith.constant 0 : i32
    %c0_i32_0 = arith.constant 0 : i32
    return %arg0, %c0_i32 : i32, i32
  }
  func.func @transform_1(%arg0: i32) -> (i32, i32) {
    %c0_i32 = arith.constant 0 : i32
    %c0_i32_0 = arith.constant 0 : i32
    %c0_i32_1 = arith.constant 0 : i32
    return %c0_i32, %c0_i32_0 : i32, i32
  }
  func.func @transform_2(%arg0: i32) -> (i32, i32) {
    %c0_i32 = arith.constant 0 : i32
    %c0_i32_0 = arith.constant 0 : i32
    %c0_i32_1 = arith.constant 0 : i32
    return %c0_i32, %c0_i32_0 : i32, i32
  }
  func.func @transform_3(%arg0: i32) -> (i32, i32) {
    %c0_i32 = arith.constant 0 : i32
    %c0_i32_0 = arith.constant 0 : i32
    %c0_i32_1 = arith.constant 0 : i32
    return %c0_i32, %c0_i32_0 : i32, i32
  }
  func.func @transform_4(%arg0: i32) -> (i32, i32) {
    %c0_i32 = arith.constant 0 : i32
    %c0_i32_0 = arith.constant 0 : i32
    return %arg0, %c0_i32 : i32, i32
  }
}

</mosaic_0001>

<bundles_post_ra>
// kernel: tpu_custom_call.1
= control target key start
LH: loop header
LB: loop body
LE: loop exit
PB: predicated region body
PF: predicated region fallthrough
CT: control target
= control target key end

     0   :  { %9 = vsyncpa [#allocation3], 0  ;;  %s3528_s0 = inlined_call_operand.hbm [shape: bf16[512,128], index: 0, kind: input, shape index: {}]   ;;  %s3529_s1 = inlined_call_operand.hbm [shape: bf16[128,384], index: 1, kind: input, shape index: {}]   ;;  %s3530_s2 = inlined_call_operand.hbm [shape: bf16[128,128], index: 2, kind: input, shape index: {}]   ;;  %s3531_s3 = inlined_call_operand.vmem [shape: f32[1,128], index: 3, kind: input, shape index: {}]   ;;  %s3532_s4 = inlined_call_operand.hbm [shape: f32[512,128], index: 4, kind: output, shape index: {}]  }
   0x1   :  { %11 = vsyncpa [#allocation3 + $0x1], 0 }
   0x2   :  { %12 = vsyncpa [#allocation6], 0 }
   0x3   :  { %13 = vsyncpa [#allocation4], 0 }
   0x4   :  { %15 = vsyncpa [#allocation4 + $0x1], 0  ;;  %s2745_s15 = smov 0   ;;  %s2747_s16 = smov 0  }
   0x5   :  { %s2749_s17 = smov 0   ;;  %s2751_s18 = smov 0  }
   0x6 LB: > { %s2766_s19 = sadd.s32 4294967295, %s2706_s18   ;;  %s2070_s20 = sadd.s32 4294967294, %s2706_s18   ;;  %s2706_s18 = sphi %s2751_s18, %s3557_s18   ;;  %s2702_s17 = sphi %s2749_s17, %s3556_s17   ;;  %s2698_s16 = sphi %s2747_s16, %s3555_s16   ;;  %s2694_s15 = sphi %s2745_s15, %s3554_s15  }
   0x7   : > { %p41_p0 = scmp.ne.s32.totalorder %s2698_s16, %s2694_s15  ;;  %p42_p1 = scmp.eq.s32.totalorder %s2766_s19, 0 }
   0x8   : > { %p128_p2 = scmp.eq.s32.totalorder %s2766_s19, 7  ;;  %p134_p3 = scmp.eq.s32.totalorder %s2070_s20, 7 }
   0x9   : > { %p2775_p4 = por %p42_p1, %p41_p0  ;;  %p2071_p5 = scmp.ge.s32.totalorder %s2706_s18, 1 }
   0xa   : > { %p2780_p6 = por %p134_p3, %p41_p0  ;;  %p141_p7 = scmp.lt.s32.totalorder %s2706_s18, 9 }
   0xb   : > { %s152_s25 = sshll.u32 %s3529_s1, 4  ;;  %s2708_s27 = smov [#allocation5]   ;;  %s153_s25 = int_to_ptr.hbm [resolvable:$true] %s152_s25 }
   0xc   : > { %p2788_p8 = pnand %p2071_p5, %p141_p7  ;;  %s154_s28 = sshll.u32 %s2708_s27, 4  ;;  %s155_s28 = int_to_ptr.vmem [resolvable:$true] %s154_s28 }
   0xd   : > { %s166_s5 = sshll.u32 %s3530_s2, 4  ;;  %s2709_s6 = smov 192   ;;  %s167_s5 = int_to_ptr.hbm [resolvable:$true] %s166_s5 }
   0xe   : > { %p2352_p9 = pneg %p2788_p8  ;;  %s2710_s7 = smov 12  }
   0xf   : > { %s2711_s8 = smov [#allocation7]   ;;  %s2712_s10 = smov 64  }
  0x10   : > { %p2353_p10 = pnand %p2352_p9, %p42_p1  ;;  %s168_s9 = sshll.u32 %s2711_s8, 4  ;;  %s169_s9 = int_to_ptr.vmem [resolvable:$true] %s168_s9 }
  0x11   : > { %s2713_s11 = smov 4   ;;  %s2803_s12 = sadd.s32 1, %s2706_s18  }
  0x12   : > { %2355 = dma.hbm_to_vmem [thread:$0]  (!%p2353_p10), %s153_s25, 3072, %s155_s28, [#allocation6], %s2709_s6, %s2709_s6, %s2710_s7  }
  0x13   : > { %2358 = dma.hbm_to_vmem [thread:$0]  (!%p2353_p10), %s167_s5, 1024, %s169_s9, [#allocation6], %s2712_s10, %s2712_s10, %s2713_s11  }
  0x14   : > { %s25_s13 = ssub.s32 %s2706_s18, %s2803_s12  ;;  %s28_s14 = sadd.s32 1, %s2702_s17 }
  0x15   : > { %p26_p11 = scmp.eq.s32.totalorder %s25_s13, 0  ;;  %p35_p12 = scmp.ne.s32.totalorder %s2702_s17, %s2698_s16 }
  0x16   : > { %p36_p13 = scmp.eq.s32.totalorder %s2706_s18, 0  ;;  %p2369_p5 = scmp.lt.s32.totalorder %s2706_s18, 8 }
  0x17   : > { %s2812_s20 = scalar_select %p26_p11, %s2702_s17, %s28_s14  }
  0x18   : > { %p37_p0 = por %p36_p13, %p35_p12  ;;  %p2816_p3 = por %p128_p2, %p35_p12 }
  0x19   : > { %s185_s24 = sand.u32 1, %s2702_s17   ;;  %s2288_s27 = sshll.u32 %s2706_s18, 5 }
  0x1a   : > { %s2075_s25 = sshll.u32 %s185_s24, 5  ;;  %s194_s30 = scalar_lea.hbm %s3528_s0, %s2288_s27 }
  0x1b   : > { %s189_s5 = scalar_lea.vmem [#allocation2], %s2075_s25  ;;  %s195_s7 = sshll.u32 %s194_s30, 4  ;;  %s196_s7 = int_to_ptr.hbm [resolvable:$true] %s195_s7 }
  0x1c   : > { %s197_s6 = sshll.u32 %s189_s5, 4  ;;  %p2826_p7 = pnand %p2369_p5, %p37_p0  ;;  %s198_s6 = int_to_ptr.vmem [resolvable:$true] %s197_s6 }
  0x1d   : > { %s186_s9 = scalar_lea.sflag [#allocation3], %s185_s24  ;;  %s2606_s13 = sshra.s32 %s196_s7, 4  ;;  %s2607_s13 = int_to_ptr.hbm [resolvable:$true] %s2606_s13 }
  0x1e   : > { %s2608_s14 = scalar_lea.hbm %s2607_s13, 32  ;;  %p2610_p9 = pneg %p2826_p7 }
  0x1f   : > { %p2609_p2 = scmp.ne.s32.totalorder %s2607_s13, %s2608_s14  ;;  %s2613_s28 = scalar_lea.hbm %s3528_s0, 256 }
  0x20   : > { %p2614_p12 = scmp.lt.s32.totalorder %s2607_s13, %s3528_s0  ;;  %p2615_p13 = scmp.lt.s32.totalorder %s2613_s28, %s2608_s14 }
  0x21   : > { %p2611_p10 = pnand %p2610_p9, %p2609_p2 }
  0x22   : > { %p2616_p0 = por %p2615_p13, %p2614_p12 }
  0x23   : > { %p2612_p11 = pneg %p2611_p10 }
  0x25   : > { %p2617_p5 = pnand %p2616_p0, %p2612_p11 }
  0x27   : > { %2620 = shalt.err (!%p2617_p5)
}
  0x28   : > { %2362 = dma.hbm_to_vmem [thread:$0]  (!%p2826_p7), %s196_s7, 512, %s198_s6, %s186_s9, %s2712_s10, %s2712_s10, %s2713_s11  }
  0x29   : > { %209 = sbr.rel (%p2788_p8) target bundleno = 1379 (0x563), region = 36  ;;  %s2846_s24 = sand.u32 (!%p2788_p8), 1, %s2698_s16  }
  0x2a   : > { %s2079_s5 = sshll.u32 (!%p2788_p8), %s2846_s24, 5  ;;  %s212_s13 = scalar_lea.sflag (!%p2788_p8), [#allocation3], %s2846_s24 }
  0x2b   : > { %s2850_s14 = scalar_lea.vmem (!%p2788_p8), [#allocation2], %s2079_s5 }
  0x2e   : > { %2681 = dma.done.wait (%p2775_p4), %s212_s13, 512  }
  0x2f   : > { %2683 = vsyncadd (%p2775_p4), %s212_s13, 4294966784 }
  0x30   : > { %2685 = dma.done.wait (%p42_p1), [#allocation6], 4096  }
  0x31   : > { %2687 = vsyncadd (%p42_p1), [#allocation6], 4294963200  ;;  %v2193_v0 = vld [vmem:[#allocation5 + $0xa8] sm:$0xf]  ;;  %v2315_v1 = vld [vmem:[#allocation5 + $0xb0] sm:$0xf0] }
  0x32   : > { %v2181_v2 = vld [vmem:[#allocation5 + $0x90] sm:$0xf]  ;;  %v2194_v3 = vor.u32 %v2315_v1, %v2193_v0  ;;  %v2312_v4 = vld [vmem:[#allocation5 + $0x98] sm:$0xf0]  ;;  %v2314_v5 = vld [vmem:[#allocation5 + $0xac] sm:$0xf] }
  0x33   : > { %v2195_v6 = vld [vmem:[#allocation5 + $0xb4] sm:$0xf0]  ;;  %v2182_v7 = vor.u32 %v2312_v4, %v2181_v2  ;;  %v2311_v9 = vld [vmem:[#allocation5 + $0x94] sm:$0xf]  ;;  %v2183_v10 = vld [vmem:[#allocation5 + $0x9c] sm:$0xf0] }
  0x34   : > { %661 = vmatpush.bf16.msra.mxu0 %v2194_v3  ;;  %v2198_v8 = vor.u32 %v2314_v5, %v2195_v6  ;;  %v2169_v11 = vld [vmem:[#allocation5 + $0x78] sm:$0xf]  ;;  %v2309_v12 = vld [vmem:[#allocation5 + $0x80] sm:$0xf0]  ;;  %v2186_v13 = vor.u32 %v2311_v9, %v2183_v10  ;;  %v2308_v14 = vld [vmem:[#allocation5 + $0x7c] sm:$0xf] }
  0x35   : > { %v2171_v15 = vld [vmem:[#allocation5 + $0x84] sm:$0xf0]  ;;  %v2170_v16 = vor.u32 %v2309_v12, %v2169_v11  ;;  %v2157_v17 = vld [vmem:[#allocation5 + $0x60] sm:$0xf]  ;;  %v2306_v18 = vld [vmem:[#allocation5 + $0x68] sm:$0xf0] }
  0x36   : > { %2326 = vmatpush.bf16.msra.mxu1 %v2198_v8  ;;  %v2174_v19 = vor.u32 %v2308_v14, %v2171_v15  ;;  %v2305_v20 = vld [vmem:[#allocation5 + $0x64] sm:$0xf]  ;;  %v2159_v21 = vld [vmem:[#allocation5 + $0x6c] sm:$0xf0]  ;;  %v2158_v22 = vor.u32 %v2306_v18, %v2157_v17  ;;  %v2145_v23 = vld [vmem:[#allocation5 + $0x48] sm:$0xf] }
  0x37   : > { %v2303_v24 = vld [vmem:[#allocation5 + $0x50] sm:$0xf0]  ;;  %v2162_v25 = vor.u32 %v2305_v20, %v2159_v21  ;;  %v2302_v26 = vld [vmem:[#allocation5 + $0x4c] sm:$0xf]  ;;  %v2147_v27 = vld [vmem:[#allocation5 + $0x54] sm:$0xf0] }
  0x38   : > { %662 = vmatpush.bf16.msra.mxu0 %v2182_v7  ;;  %v2146_v28 = vor.u32 %v2303_v24, %v2145_v23  ;;  %v2133_v29 = vld [vmem:[#allocation5 + $0x30] sm:$0xf]  ;;  %v2300_v30 = vld [vmem:[#allocation5 + $0x38] sm:$0xf0]  ;;  %v2150_v31 = vor.u32 %v2302_v26, %v2147_v27  ;;  %v2299_v32 = vld [vmem:[#allocation5 + $0x34] sm:$0xf] }
  0x39   : > { %v2135_v33 = vld [vmem:[#allocation5 + $0x3c] sm:$0xf0]  ;;  %v2134_v34 = vor.u32 %v2300_v30, %v2133_v29  ;;  %v2121_v35 = vld [vmem:[#allocation5 + $0x18] sm:$0xf]  ;;  %v2297_v36 = vld [vmem:[#allocation5 + $0x20] sm:$0xf0] }
  0x3a   : > { %2327 = vmatpush.bf16.msra.mxu1 %v2186_v13  ;;  %v2138_v37 = vor.u32 %v2299_v32, %v2135_v33  ;;  %v2296_v38 = vld [vmem:[#allocation5 + $0x1c] sm:$0xf]  ;;  %v2123_v39 = vld [vmem:[#allocation5 + $0x24] sm:$0xf0]  ;;  %v2122_v40 = vor.u32 %v2297_v36, %v2121_v35  ;;  %v2109_v41 = vld [vmem:[#allocation5] sm:$0xf] }
  0x3b   : > { %v2294_v42 = vld [vmem:[#allocation5 + $0x8] sm:$0xf0]  ;;  %v2126_v43 = vor.u32 %v2296_v38, %v2123_v39  ;;  %v2293_v44 = vld [vmem:[#allocation5 + $0x4] sm:$0xf]  ;;  %v2111_v45 = vld [vmem:[#allocation5 + $0xc] sm:$0xf0] }
  0x3c   : > { %663 = vmatpush.bf16.msra.mxu0 %v2170_v16  ;;  %v2110_v46 = vor.u32 %v2294_v42, %v2109_v41  ;;  %v2114_v47 = vor.u32 %v2293_v44, %v2111_v45  ;;  %v2861_v48 = vld [vmem:[%s2850_s14] sm:$0xff]  ;;  %v2864_v49 = vld [vmem:[%s2850_s14 + $0x8] sm:$0xff]  ;;  %v2869_v50 = vld [vmem:[%s2850_s14 + $0x10] sm:$0xff]  ;;  %s2714_s21 = smov 96   ;;  %vm796_vm0 = vcmask 261120   ;;  %s2715_s26 = smov 64  }
  0x3d   : > { %v2874_v51 = vld [vmem:[%s2850_s14 + $0x18] sm:$0xff]  ;;  %v2201_v58 = vld [vmem:[#allocation5 + $0xb0] sm:$0xf]  ;;  %v2313_v5 = vld [vmem:[#allocation5 + $0xa0] sm:$0xf0]  ;;  %s2716_s10 = smov 32  }
  0x3e   : > { %2328 = vmatpush.bf16.msra.mxu1 %v2174_v19  ;;  %v2316_v59 = vld [vmem:[#allocation5 + $0xb8] sm:$0xf0]  ;;  %v2189_v4 = vld [vmem:[#allocation5 + $0x98] sm:$0xf]  ;;  %v2177_v9 = vld [vmem:[#allocation5 + $0x80] sm:$0xf] }
  0x3f   : > { %v2202_v61 = vor.u32 %v2316_v59, %v2201_v58  ;;  %v2190_v6 = vor.u32 %v2313_v5, %v2189_v4  ;;  %v2310_v10 = vld [vmem:[#allocation5 + $0x88] sm:$0xf0]  ;;  %v2307_v14 = vld [vmem:[#allocation5 + $0x70] sm:$0xf0]  ;;  %v2153_v18 = vld [vmem:[#allocation5 + $0x50] sm:$0xf] }
  0x40   : > { %664 = vmatpush.bf16.msra.mxu0 %v2158_v22  ;;  %v2178_v12 = vor.u32 %v2310_v10, %v2177_v9  ;;  %v2141_v27 = vld [vmem:[#allocation5 + $0x38] sm:$0xf]  ;;  %v2129_v33 = vld [vmem:[#allocation5 + $0x20] sm:$0xf]  ;;  %v2295_v38 = vld [vmem:[#allocation5 + $0x10] sm:$0xf0]  ;;  %v262_v9 = vlaneseq }
  0x41   : > { %719 = vmatpush.bf16.msra.mxu2 %v2202_v61  ;;  %vm858_vm11 = vcmask 523264   ;;  %s2082_s11 = sshll.u32 %s2846_s24, 6  ;;  %s2325_s9 = sshll.u32 %s2766_s19, 6 }
  0x42   : > { %2329 = vmatpush.bf16.msra.mxu1 %v2162_v25  ;;  %s3483_s8 = scalar_lea.vmem [#allocation8], %s2082_s11  ;;  %s1974_s28 = scalar_lea.hbm %s3532_s4, %s2325_s9 }
  0x43   : > { %s1975_s29 = sshll.u32 %s3483_s8, 4  ;;  %s1977_s30 = sshll.u32 %s1974_s28, 4  ;;  %s1976_s29 = int_to_ptr.vmem [resolvable:$true] %s1975_s29  ;;  %s1978_s30 = int_to_ptr.hbm [resolvable:$true] %s1977_s30 }
  0x44   : > { %665 = vmatpush.bf16.msra.mxu0 %v2146_v28  ;;  %v2301_v28 = vld [vmem:[#allocation5 + $0x40] sm:$0xf0]  ;;  %s1963_s5 = scalar_lea.sflag [#allocation4], %s2846_s24  ;;  %s2650_s13 = sshra.s32 %s1978_s30, 4  ;;  %s2651_s13 = int_to_ptr.hbm [resolvable:$true] %s2650_s13 }
  0x45   : > { %720 = vmatpush.bf16.msra.mxu2 %v2190_v6  ;;  %v2142_v29 = vor.u32 %v2301_v28, %v2141_v27  ;;  %s2652_s19 = scalar_lea.hbm %s2651_s13, 64  ;;  %p2657_p7 = scmp.lt.s32.totalorder %s2651_s13, %s3532_s4 }
  0x46   : > { %2330 = vmatpush.bf16.msra.mxu1 %v2150_v31  ;;  %p2653_p1 = scmp.ne.s32.totalorder %s2651_s13, %s2652_s19 }
  0x48   : > { %666 = vmatpush.bf16.msra.mxu0 %v2134_v34  ;;  %v2298_v34 = vld [vmem:[#allocation5 + $0x28] sm:$0xf0]  ;;  %p2654_p4 = pnand %p2653_p1, %p2816_p3 }
  0x49   : > { %721 = vmatpush.bf16.msra.mxu2 %v2178_v12  ;;  %v2130_v36 = vor.u32 %v2298_v34, %v2129_v33  ;;  %v263_v33 = vshrl.u32 %v262_v9, 7 }
  0x4a   : > { %2331 = vmatpush.bf16.msra.mxu1 %v2138_v37  ;;  %p2655_p8 = pneg %p2654_p4 }
  0x4c   : > { %667 = vmatpush.bf16.msra.mxu0 %v2122_v40 }
  0x4e   : > { %2332 = vmatpush.bf16.msra.mxu1 %v2126_v43 }
  0x50   : > { %668 = vmatpush.bf16.msra.mxu0 %v2110_v46 }
  0x52   : > { %2333 = vmatpush.bf16.msra.mxu1 %v2114_v47 }
  0x53   : > { %669 = vmatmul.bf16.vlgmr.msra.gmra.mxu0 %v2861_v48 }
  0x54   : > { %690 = vmatpush.bf16.msrb.mxu0 %v2198_v8 }
  0x55   : > { %703 = vmatmul.bf16.vlgmr.msra.gmra.mxu1 %v2864_v49 }
  0x58   : > { %691 = vmatpush.bf16.msrb.mxu0 %v2186_v13  ;;  %v2165_v13 = vld [vmem:[#allocation5 + $0x68] sm:$0xf] }
  0x59   : > { %v2166_v16 = vor.u32 %v2307_v14, %v2165_v13 }
  0x5b   : > { %722 = vmatpush.bf16.msra.mxu2 %v2166_v16 }
  0x5c   : > { %692 = vmatpush.bf16.msrb.mxu0 %v2174_v19  ;;  %v2304_v19 = vld [vmem:[#allocation5 + $0x58] sm:$0xf0] }
  0x5d   : > { %v2154_v21 = vor.u32 %v2304_v19, %v2153_v18 }
  0x5f   : > { %723 = vmatpush.bf16.msra.mxu2 %v2154_v21 }
  0x60   : > { %693 = vmatpush.bf16.msrb.mxu0 %v2162_v25 }
  0x63   : > { %674 = vmatmul.bf16.gmra.mxu0 %v2864_v49  ;;  %724 = vmatpush.bf16.msra.mxu2 %v2142_v29 }
  0x64   : > { %694 = vmatpush.bf16.msrb.mxu0 %v2150_v31 }
  0x65   : > { %708 = vmatmul.bf16.gmra.mxu1 %v2869_v50 }
  0x67   : > { %725 = vmatpush.bf16.msra.mxu2 %v2130_v36 }
  0x68   : > { %695 = vmatpush.bf16.msrb.mxu0 %v2138_v37  ;;  %v2117_v37 = vld [vmem:[#allocation5 + $0x8] sm:$0xf] }
  0x69   : > { %v2118_v39 = vor.u32 %v2295_v38, %v2117_v37  ;;  %v264_v37 = vadd.s32 8, %v263_v33 }
  0x6b   : > { %726 = vmatpush.bf16.msra.mxu2 %v2118_v39 }
  0x6c   : > { %696 = vmatpush.bf16.msrb.mxu0 %v2126_v43 }
  0x6e   : > { %727 = vmatmul.bf16.vlgmr.msra.gmra.mxu2 %v2861_v48 }
  0x70   : > { %697 = vmatpush.bf16.msrb.mxu0 %v2114_v47 }
  0x73   : > { %679 = vmatmul.bf16.gmra.mxu0 %v2869_v50 }
  0x75   : > { %713 = vmatmul.bf16.gmra.mxu1 %v2874_v51 }
  0x7e   : > { %732 = vmatmul.bf16.gmra.mxu2 %v2864_v49 }
  0x83   : > { %684 = vmatmul.bf16.gmra.mxu0 %v2874_v51 }
  0x8e   : > { %737 = vmatmul.bf16.gmra.mxu2 %v2869_v50 }
  0x93   : > { %698 = vmatmul.bf16.vlgmr.msrb.gmra.mxu0 %v2861_v48 }
  0x9e   : > { %742 = vmatmul.bf16.gmra.mxu2 %v2874_v51 }
  0xd0   : > { %v2880_v52 = vpop.f32.mrf.mxu0 }
  0xd2   : > { %v704_v53 = vpop.f32.mrf.mxu1 }
  0xd8   : > { %v2882_v54 = vpop.f32.mrf.mxu0 }
  0xda   : > { %v706_v56 = vpop.f32.mrf.mxu1 }
  0xe0   : > { %v675_v55 = vpop.f32.mrf.mxu0 }
  0xe1   : > { %v752_v57 = vpack.c.bf16 %v704_v53, %v675_v55 }
  0xe2   : > { %v709_v63 = vpop.f32.mrf.mxu1 }
  0xe3   : > { %v774_v0 = vunpack.c.l.b16 %v752_v57  ;;  %v786_v1 = vunpack.c.h.b16 %v752_v57 }
  0xe8   : > { %v677_v60 = vpop.f32.mrf.mxu0 }
  0xe9   : > { %v754_v62 = vpack.c.bf16 %v706_v56, %v677_v60 }
  0xea   : > { %v711_v15 = vpop.f32.mrf.mxu1 }
  0xeb   : > { %v775_v2 = vunpack.c.l.b16 %v754_v62  ;;  %v787_v3 = vunpack.c.h.b16 %v754_v62 }
  0xed   : > { %v2884_v7 = vpack.c.b16 %v775_v2, %v774_v0  ;;  %v2886_v8 = vpack.c.b16 %v787_v3, %v786_v1 }
  0xef   : > { %1034 = vrot.lane.b32.xlu0 %v2886_v8, %s2714_s21  ;;  %1026 = vrot.lane.b32.xlu2 %v2884_v7, %s2714_s21 }
  0xf0   : > { %v680_v11 = vpop.f32.mrf.mxu0 }
  0xf1   : > { %v756_v17 = vpack.c.bf16 %v709_v63, %v680_v11  ;;  %v2941_v11 = vand.u32 127, %v262_v9  ;;  %v2943_v12 = vpop.f32.mrf.mxu2 }
  0xf2   : > { %v714_v32 = vpop.f32.mrf.mxu1 }
  0xf3   : > { %v776_v23 = vunpack.c.l.b16 %v756_v17  ;;  %v788_v24 = vunpack.c.h.b16 %v756_v17  ;;  %vm289_vm1 = vcmp.ge.s32.totalorder %v2941_v11, 8  ;;  %vm315_vm2 = vcmp.ge.s32.totalorder %v2941_v11, 16 }
  0xf4   : > { %vm342_vm3 = vcmp.ge.s32.totalorder %v2941_v11, 24  ;;  %vm369_vm4 = vcmp.ge.s32.totalorder %v2941_v11, 32  ;;  %vm396_vm5 = vcmp.ge.s32.totalorder %v2941_v11, 40  ;;  %vm423_vm6 = vcmp.ge.s32.totalorder %v2941_v11, 48 }
  0xf5   : > { %vm450_vm7 = vcmp.ge.s32.totalorder %v2941_v11, 56  ;;  %vm461_vm9 = vcmp.ge.s32.totalorder %v263_v33, %v2941_v11  ;;  %vm462_vm13 = vcmp.ge.s32.totalorder %v264_v37, %v2941_v11 }
  0xf8   : > { %v682_v20 = vpop.f32.mrf.mxu0 }
  0xf9   : > { %v758_v22 = vpack.c.bf16 %v711_v15, %v682_v20  ;;  %v2717_v15 = vmov 0   ;;  %v2949_v18 = vpop.f32.mrf.mxu2 }
  0xfa   : > { %v716_v41 = vpop.f32.mrf.mxu1  ;;  %v290_v16 = vsel %vm289_vm1, 1, %v2717_v15  ;;  %v316_v17 = vsel %vm315_vm2, 1, %v2717_v15  ;;  %v343_v20 = vsel %vm342_vm3, 1, %v2717_v15  ;;  %v424_v28 = vsel %vm423_vm6, 1, %v2717_v15 }
  0xfb   : > { %v777_v25 = vunpack.c.l.b16 %v758_v22  ;;  %v789_v26 = vunpack.c.h.b16 %v758_v22  ;;  %v317_v19 = vadd.s32 %v316_v17, %v290_v16  ;;  %v749_v17 = vpack.c.bf16 %v2943_v12, %v2943_v12 }
  0xfd   : > { %v2892_v30 = vpack.c.b16 %v777_v25, %v776_v23  ;;  %v794_v31 = vpack.c.b16 %v789_v26, %v788_v24  ;;  %v344_v22 = vadd.s32 %v343_v20, %v317_v19  ;;  %v370_v23 = vsel %vm369_vm4, 1, %v2717_v15 }
  0xfe   : > { %v397_v26 = vsel %vm396_vm5, 1, %v2717_v15  ;;  %v751_v19 = vpack.c.bf16 %v2949_v18, %v2949_v18  ;;  %v943_v12 = vunpack.c.l.b16 %v749_v17 }
  0xff   : > { %1036 = vrot.lane.b32.xlu2 %v794_v31, %s2714_s21  ;;  %1028 = vrot.lane.b32.xlu1 %v2892_v30, %s2714_s21  ;;  %v816_v48 = vsel %vm796_vm0, %v794_v31, 0  ;;  %v371_v25 = vadd.s32 %v370_v23, %v344_v22 }
 0x100   : > { %v685_v35 = vpop.f32.mrf.mxu0  ;;  %v944_v18 = vunpack.c.l.b16 %v751_v19 }
 0x101   : > { %v760_v40 = vpack.c.bf16 %v714_v32, %v685_v35  ;;  %v2954_v24 = vpop.f32.mrf.mxu2  ;;  %v398_v27 = vadd.s32 %v397_v26, %v371_v25  ;;  %v451_v32 = vsel %vm450_vm7, 1, %v2717_v15 }
 0x103   : > { %v778_v44 = vunpack.c.l.b16 %v760_v40  ;;  %v790_v45 = vunpack.c.h.b16 %v760_v40 }
 0x108   : > { %v687_v42 = vpop.f32.mrf.mxu0 }
 0x109   : > { %v762_v43 = vpack.c.bf16 %v716_v41, %v687_v42  ;;  %v2958_v29 = vpop.f32.mrf.mxu2  ;;  %v268_v42 = vadd.s32 40, %v263_v33 }
 0x10b   : > { %v779_v46 = vunpack.c.l.b16 %v762_v43  ;;  %v791_v47 = vunpack.c.h.b16 %v762_v43  ;;  %vm466_vm1 = vcmp.ge.s32.totalorder %v268_v42, %v2941_v11 }
 0x10d   : > { %v2898_v53 = vpack.c.b16 %v779_v46, %v778_v44  ;;  %v2900_v55 = vpack.c.b16 %v791_v47, %v790_v45  ;;  %v265_v44 = vadd.s32 16, %v263_v33 }
 0x10f   : > { %1038 = vrot.lane.b32.xlu2 %v2900_v55, %s2714_s21  ;;  %v819_v56 = vsel %vm796_vm0, %v2900_v55, 0  ;;  %vm463_vm4 = vcmp.ge.s32.totalorder %v265_v44, %v2941_v11 }
 0x110   : > { %v699_v57 = vpop.f32.mrf.mxu0  ;;  %825 = vmatpush.bf16.xpose.msra.mxu3 %v819_v56 }
 0x111   : > { %v748_v58 = vpack.c.bf16 %v699_v57, %v2880_v52  ;;  %v813_v52 = vsel %vm796_vm0, %v2886_v8, 0  ;;  %v738_v35 = vpop.f32.mrf.mxu2 }
 0x113   : > { %v772_v61 = vunpack.c.l.b16 %v748_v58  ;;  %v784_v62 = vunpack.c.h.b16 %v748_v58  ;;  %v269_v58 = vadd.s32 48, %v263_v33 }
 0x115   : > { %vm467_vm7 = vcmp.ge.s32.totalorder %v269_v58, %v2941_v11 }
 0x118   : > { %v701_v59 = vpop.f32.mrf.mxu0  ;;  %826 = vmatpush.bf16.xpose.msra.mxu3 %v816_v48 }
 0x119   : > { %v750_v60 = vpack.c.bf16 %v701_v59, %v2882_v54  ;;  %v740_v41 = vpop.f32.mrf.mxu2  ;;  %v266_v59 = vadd.s32 24, %v263_v33 }
 0x11b   : > { %v773_v63 = vunpack.c.l.b16 %v750_v60  ;;  %v785_v0 = vunpack.c.h.b16 %v750_v60 }
 0x11d   : > { %v2910_v1 = vpack.c.b16 %v773_v63, %v772_v61  ;;  %v2912_v2 = vpack.c.b16 %v785_v0, %v784_v62  ;;  %v757_v0 = vpack.c.bf16 %v738_v35, %v738_v35 }
 0x11f   : > { %1032 = vrot.lane.b32.xlu1 %v2912_v2, %s2714_s21  ;;  %1024 = vrot.lane.b32.xlu2 %v2910_v1, %s2714_s21  ;;  %v810_v49 = vsel %vm796_vm0, %v2912_v2, 0 }
 0x120   : > { %827 = vmatpush.bf16.xpose.msra.mxu3 %v813_v52  ;;  %v759_v52 = vpack.c.bf16 %v740_v41, %v740_v41  ;;  %v3092_v41 = vld [vmem:[#allocation7 + $0x8] sm:$0xff] }
 0x121   : > { %v743_v57 = vpop.f32.mrf.mxu2 }
 0x122   : > { %v761_v60 = vpack.c.bf16 %v743_v57, %v743_v57  ;;  %v948_v9 = vunpack.c.l.b16 %v759_v52 }
 0x127   : > { %1372 = vrot.lane.b32.xlu2 %v794_v31, %s2715_s26 }
 0x128   : > { %828 = vmatpush.bf16.xpose.msra.mxu3 %v810_v49 }
 0x12f   : > { %1370 = vrot.lane.b32.xlu2 %v2886_v8, %s2715_s26  ;;  %2203 = vmatmul.msk.bf16.vlgmr.msra.gmra.mxu3 %vm796_vm0, %v2910_v1 }
 0x137   : > { %1663 = vrot.lane.b32.xlu2 %v794_v31, %s2716_s10  ;;  %v425_v31 = vadd.s32 %v424_v28, %v398_v27 }
 0x139   : > { %v2960_v34 = vadd.s32 %v451_v32, %v425_v31 }
 0x13b   : > { %vm2083_vm8 = vcmp.eq.s32.totalorder %v2960_v34, 0  ;;  %vm2084_vm12 = vcmp.eq.s32.totalorder %v2960_v34, 1  ;;  %vm2088_vm15 = vcmp.eq.s32.totalorder %v2960_v34, 5  ;;  %vm2085_vm3 = vcmp.eq.s32.totalorder %v2960_v34, 2 }
 0x13c   : > { %vm2965_vm10 = vmand %vm2083_vm8, %vm461_vm9  ;;  %vm2089_vm6 = vcmp.eq.s32.totalorder %v2960_v34, 6  ;;  %vm2086_vm9 = vcmp.eq.s32.totalorder %v2960_v34, 3 }
 0x13d   : > { %vm2977_vm14 = vmand %vm2084_vm12, %vm462_vm13  ;;  %vm464_vm12 = vcmp.ge.s32.totalorder %v266_v59, %v2941_v11  ;;  %vm2090_vm13 = vcmp.eq.s32.totalorder %v2960_v34, 7 }
 0x13e   : > { %vm2984_vm2 = vmand %vm2088_vm15, %vm466_vm1 }
 0x13f   : > { %1368 = vrot.lane.b32.xlu2 %v2912_v2, %s2715_s26  ;;  %2204 = vmatmul.msk.bf16.gmra.mxu3 %vm796_vm0, %v2884_v7  ;;  %vm2996_vm5 = vmand %vm2085_vm3, %vm463_vm4  ;;  %vm2087_vm4 = vcmp.eq.s32.totalorder %v2960_v34, 4 }
 0x140   : > { %vm3002_vm8 = vmand %vm2089_vm6, %vm467_vm7 }
 0x141   : > { %vm3019_vm15 = vmand %vm2086_vm9, %vm464_vm12 }
 0x149   : > { %v1027_v50 = vpop.permute.xlu2 %1026 }
 0x14f   : > { %2205 = vmatmul.msk.bf16.gmra.mxu3 %vm796_vm0, %v2892_v30 }
 0x159   : > { %v1037_v54 = vpop.permute.xlu2 %1036 }
 0x15a   : > { %v1059_v51 = vsel %vm796_vm0, %v1037_v54, 0  ;;  %v949_v54 = vunpack.c.l.b16 %v761_v60 }
 0x15f   : > { %2206 = vmatmul.msk.bf16.gmra.mxu3 %vm796_vm0, %v2898_v53 }
 0x161   : > { %v1035_v5 = vpop.permute.xlu0 %1034 }
 0x162   : > { %v1056_v6 = vsel %vm796_vm0, %v1035_v5, 0  ;;  %v755_v5 = vpack.c.bf16 %v2958_v29, %v2958_v29  ;;  %v3054_v29 = vpack.c.b16 %v944_v18, %v943_v12 }
 0x164   : > { %v946_v22 = vunpack.c.l.b16 %v755_v5 }
 0x169   : > { %v1039_v3 = vpop.permute.xlu2 %1038 }
 0x16a   : > { %v1062_v4 = vsel %vm796_vm0, %v1039_v3, 0 }
 0x16b   : > { %1068 = vmatpush.bf16.xpose.msrb.mxu1 %v1062_v4  ;;  %v753_v4 = vpack.c.bf16 %v2954_v24, %v2954_v24 }
 0x171   : > { %v1029_v10 = vpop.permute.xlu1 %1028 }
 0x173   : > { %1069 = vmatpush.bf16.xpose.msrb.mxu1 %v1059_v51  ;;  %v270_v51 = vadd.s32 56, %v263_v33 }
 0x175   : > { %vm468_vm1 = vcmp.ge.s32.totalorder %v270_v51, %v2941_v11 }
 0x176   : > { %vm3026_vm3 = vmand %vm2090_vm13, %vm468_vm1 }
 0x179   : > { %v1025_v21 = vpop.permute.xlu2 %1024 }
 0x17b   : > { %1070 = vmatpush.bf16.xpose.msrb.mxu1 %v1056_v6  ;;  %v947_v6 = vunpack.c.l.b16 %v757_v0 }
 0x17d   : > { %v3038_v24 = vpack.c.b16 %v948_v9, %v947_v6 }
 0x181   : > { %v1373_v44 = vpop.permute.xlu2 %1372 }
 0x191   : > { %v1033_v13 = vpop.permute.xlu1 %1032 }
 0x192   : > { %v1053_v14 = vsel %vm796_vm0, %v1033_v13, 0 }
 0x193   : > { %1071 = vmatpush.bf16.xpose.msrb.mxu1 %v1053_v14  ;;  %v267_v14 = vadd.s32 32, %v263_v33 }
 0x195   : > { %vm465_vm6 = vcmp.ge.s32.totalorder %v267_v14, %v2941_v11 }
 0x196   : > { %vm3048_vm7 = vmand %vm2087_vm4, %vm465_vm6 }
 0x19a   : > { %2211 = vmatmul.msk.bf16.vlgmr.msrb.gmra.mxu1 %vm796_vm0, %v1025_v21  ;;  %v945_v21 = vunpack.c.l.b16 %v753_v4 }
 0x19c   : > { %v3045_v26 = vpack.c.b16 %v946_v22, %v945_v21 }
 0x1aa   : > { %2212 = vmatmul.msk.bf16.gmra.mxu1 %vm796_vm0, %v1027_v50  ;;  %v745_v50 = vpop.f32.mrf.mxu2 }
 0x1ab   : > { %v763_v3 = vpack.c.bf16 %v745_v50, %v745_v50 }
 0x1b2   : > { %v830_v38 = vpop.f32.mrf.mxu3 }
 0x1b3   : > { %v2971_v39 = vsel %vm2965_vm10, %v830_v38, -1e+30 }
 0x1b4   : > { %v859_v40 = vsel %vm858_vm11, %v2971_v39, -inf }
 0x1b5   : > { %860 = vmax.xlane.f32.xlu0 %v859_v40 }
 0x1ba   : > { %v832_v45 = vpop.f32.mrf.mxu3  ;;  %2213 = vmatmul.msk.bf16.gmra.mxu1 %vm796_vm0, %v1029_v10  ;;  %v950_v10 = vunpack.c.l.b16 %v763_v3 }
 0x1bb   : > { %v2990_v47 = vsel %vm2977_vm14, %v832_v45, -1e+30 }
 0x1bc   : > { %v862_v56 = vsel %vm858_vm11, %v2990_v47, -inf  ;;  %v3024_v15 = vpack.c.b16 %v950_v10, %v949_v54 }
 0x1bd   : > { %863 = vmax.xlane.f32.xlu0 %v862_v56  ;;  %v3100_v56 = vld [vmem:[#allocation7] sm:$0xff] }
 0x1be   : > { %975 = vmatpush.bf16.msra.mxu0 %v3024_v15 }
 0x1c2   : > { %v835_v61 = vpop.f32.mrf.mxu3  ;;  %976 = vmatpush.bf16.msra.mxu0 %v3038_v24 }
 0x1c3   : > { %v3008_v63 = vsel %vm2996_vm5, %v835_v61, -1e+30  ;;  %v1371_v61 = vpop.permute.xlu2 %1370 }
 0x1c4   : > { %v865_v49 = vsel %vm858_vm11, %v3008_v63, -inf }
 0x1c5   : > { %866 = vmax.xlane.f32.xlu1 %v865_v49 }
 0x1c6   : > { %977 = vmatpush.bf16.msra.mxu0 %v3045_v26 }
 0x1ca   : > { %v837_v20 = vpop.f32.mrf.mxu3  ;;  %978 = vmatpush.bf16.msra.mxu0 %v3054_v29 }
 0x1cb   : > { %v3036_v23 = vsel %vm3019_vm15, %v837_v20, -1e+30  ;;  %v1664_v3 = vpop.permute.xlu2 %1663 }
 0x1cc   : > { %v868_v25 = vsel %vm858_vm11, %v3036_v23, -inf }
 0x1cd   : > { %869 = vmax.xlane.f32.xlu1 %v868_v25 }
 0x1ce   : > { %1337 = vmatpush.bf16.msrb.mxu0 %v3092_v41 }
 0x1d1   : > { %1030 = vrot.lane.b32.xlu0 %v2898_v53, %s2714_s21 }
 0x1d2   : > { %v840_v28 = vpop.f32.mrf.mxu3  ;;  %1338 = vmatpush.bf16.msrb.mxu0 %v3100_v56 }
 0x1d3   : > { %v3058_v31 = vsel %vm3048_vm7, %v840_v28, -1e+30  ;;  %v1369_v9 = vpop.permute.xlu2 %1368 }
 0x1d4   : > { %v871_v11 = vsel %vm858_vm11, %v3058_v31, -inf }
 0x1d5   : > { %872 = vmax.xlane.f32.xlu2 %v871_v11  ;;  %v1395_v11 = vsel %vm796_vm0, %v1373_v44, 0 }
 0x1d9   : > { %1665 = vrot.lane.b32.xlu0 %v2900_v55, %s2716_s10 }
 0x1da   : > { %v842_v32 = vpop.f32.mrf.mxu3 }
 0x1db   : > { %v3074_v34 = vsel %vm2984_vm2, %v842_v32, -1e+30 }
 0x1dc   : > { %v874_v35 = vsel %vm858_vm11, %v3074_v34, -inf }
 0x1e1   : > { %1360 = vrot.lane.b32.xlu0 %v2910_v1, %s2715_s26 }
 0x1e2   : > { %v845_v33 = vpop.f32.mrf.mxu3 }
 0x1e3   : > { %v3080_v37 = vsel %vm3002_vm8, %v845_v33, -1e+30 }
 0x1e6   : > { %1374 = vrot.lane.b32.xlu1 %v2900_v55, %s2715_s26  ;;  %v877_v55 = vsel %vm858_vm11, %v3080_v37, -inf }
 0x1ea   : > { %v847_v38 = vpop.f32.mrf.mxu3 }
 0x1ed   : > { %1661 = vrot.lane.b32.xlu2 %v2886_v8, %s2716_s10  ;;  %v3086_v8 = vsel %vm3026_vm3, %v847_v38, -1e+30 }
 0x1ee   : > { %v880_v40 = vsel %vm858_vm11, %v3086_v8, -inf }
 0x20b   : > { %875 = vmax.xlane.f32.xlu0 %v874_v35 }
 0x210   : > { %878 = vmax.xlane.f32.xlu1 %v877_v55 }
 0x216   : > { %881 = vmax.xlane.f32.xlu2 %v880_v40 }
 0x217   : > { %v1073_v32 = vpop.f32.mrf.mxu1 }
 0x21f   : > { %1653 = vrot.lane.b32.xlu0 %v2884_v7, %s2716_s10  ;;  %v1075_v33 = vpop.f32.mrf.mxu1 }
 0x227   : > { %1655 = vrot.lane.b32.xlu0 %v2892_v30, %s2716_s10 }
 0x228   : > { %v861_v42 = vpop.xlane.xlu0 %860 }
 0x229   : > { %v883_v45 = vsub.f32 %v2971_v39, %v861_v42  ;;  %1651 = vrot.lane.b32.xlu1 %v2910_v1, %s2716_s10 }
 0x22b   : > { %v891_v57 = vmul.f32 1.442695, %v883_v45 }
 0x22d   : > { %2418 = vpow2.f32 %v891_v57 }
 0x230   : > { %v864_v58 = vpop.xlane.xlu0 %863 }
 0x231   : > { %v884_v59 = vsub.f32 %v2990_v47, %v864_v58 }
 0x233   : > { %v2419_v60 = vpop.eup %2418  ;;  %v893_v0 = vmul.f32 1.442695, %v884_v59 }
 0x234   : > { %v907_v52 = vsel %vm858_vm11, %v2419_v60, 0.0 }
 0x235   : > { %2420 = vpow2.f32 %v893_v0  ;;  %908 = vadd.xlane.f32.xlu2 %v907_v52  ;;  %v3152_v52 = vsel %vm2965_vm10, %v1073_v32, -1e+30 }
 0x238   : > { %v867_v39 = vpop.xlane.xlu1 %866 }
 0x239   : > { %v885_v1 = vsub.f32 %v3008_v63, %v867_v39  ;;  %v3156_v39 = vsel %vm2977_vm14, %v1075_v33, -1e+30 }
 0x23b   : > { %v2421_v49 = vpop.eup %2420  ;;  %v895_v4 = vmul.f32 1.442695, %v885_v1 }
 0x23c   : > { %v931_v50 = vpack.c.bf16 %v2421_v49, %v2419_v60  ;;  %v910_v54 = vsel %vm858_vm11, %v2421_v49, 0.0  ;;  %v1104_v49 = vsel %vm858_vm11, %v3156_v39, -inf }
 0x23d   : > { %911 = vadd.xlane.f32.xlu2 %v910_v54  ;;  %2422 = vpow2.f32 %v895_v4 }
 0x23e   : > { %2207 = vmatmul.msk.bf16.vlgmr.msra.gmra.mxu0 %vm858_vm11, %v931_v50 }
 0x240   : > { %v870_v47 = vpop.xlane.xlu1 %869 }
 0x241   : > { %v886_v51 = vsub.f32 %v3036_v23, %v870_v47  ;;  %v1686_v23 = vsel %vm796_vm0, %v1664_v3, 0 }
 0x243   : > { %v897_v5 = vmul.f32 1.442695, %v886_v51  ;;  %v1031_v6 = vpop.permute.xlu0 %1030  ;;  %v2423_v10 = vpop.eup %2422 }
 0x244   : > { %2214 = vmatmul.msk.bf16.gmra.mxu1 %vm796_vm0, %v1031_v6  ;;  %v913_v21 = vsel %vm858_vm11, %v2423_v10, 0.0 }
 0x245   : > { %2424 = vpow2.f32 %v897_v5 }
 0x248   : > { %v873_v20 = vpop.xlane.xlu2 %872 }
 0x249   : > { %v887_v35 = vsub.f32 %v3058_v31, %v873_v20 }
 0x24b   : > { %v2425_v14 = vpop.eup %2424  ;;  %v1666_v63 = vpop.permute.xlu0 %1665  ;;  %v899_v38 = vmul.f32 1.442695, %v887_v35 }
 0x24c   : > { %v1689_v17 = vsel %vm796_vm0, %v1666_v63, 0  ;;  %v932_v19 = vpack.c.bf16 %v2425_v14, %v2423_v10  ;;  %v916_v22 = vsel %vm858_vm11, %v2425_v14, 0.0 }
 0x24d   : > { %1695 = vmatpush.bf16.xpose.msra.mxu0 %v1689_v17  ;;  %2426 = vpow2.f32 %v899_v38 }
 0x24e   : > { %2208 = vmatmul.msk.bf16.gmra.mxu0 %vm858_vm11, %v932_v19 }
 0x250   : > { %v1662_v12 = vpop.permute.xlu2 %1661 }
 0x251   : > { %914 = vadd.xlane.f32.xlu0 %v913_v21  ;;  %v1683_v28 = vsel %vm796_vm0, %v1662_v12, 0 }
 0x253   : > { %917 = vadd.xlane.f32.xlu1 %v916_v22  ;;  %v3141_v44 = vpop.eup %2426 }
 0x254   : > { %v919_v46 = vsel %vm858_vm11, %v3141_v44, 0.0 }
 0x255   : > { %1696 = vmatpush.bf16.xpose.msra.mxu0 %v1686_v23  ;;  %1659 = vrot.lane.b32.xlu2 %v2912_v2, %s2716_s10  ;;  %v1392_v2 = vsel %vm796_vm0, %v1371_v61, 0 }
 0x258   : > { %v1375_v25 = vpop.permute.xlu1 %1374 }
 0x259   : > { %v1398_v18 = vsel %vm796_vm0, %v1375_v25, 0 }
 0x25a   : > { %1404 = vmatpush.bf16.xpose.msra.mxu1 %v1398_v18 }
 0x25d   : > { %1697 = vmatpush.bf16.xpose.msra.mxu0 %v1683_v28  ;;  %1362 = vrot.lane.b32.xlu2 %v2884_v7, %s2715_s26  ;;  %v1389_v7 = vsel %vm796_vm0, %v1369_v9, 0 }
 0x262   : > { %1405 = vmatpush.bf16.xpose.msra.mxu1 %v1395_v11 }
 0x265   : > { %1183 = vrot.lane.b32.xlu0 %v3024_v15, %s2714_s21  ;;  %1364 = vrot.lane.b32.xlu2 %v2892_v30, %s2715_s26  ;;  %v1361_v30 = vpop.permute.xlu0 %1360 }
 0x26a   : > { %1406 = vmatpush.bf16.xpose.msra.mxu1 %v1392_v2 }
 0x26c   : > { %1657 = vrot.lane.b32.xlu1 %v2898_v53, %s2716_s10 }
 0x26d   : > { %1181 = vrot.lane.b32.xlu0 %v3038_v24, %s2714_s21  ;;  %1366 = vrot.lane.b32.xlu2 %v2898_v53, %s2715_s26  ;;  %v1078_v53 = vpop.f32.mrf.mxu1 }
 0x26e   : > { %v3187_v9 = vsel %vm2996_vm5, %v1078_v53, -1e+30 }
 0x26f   : > { %v1107_v14 = vsel %vm858_vm11, %v3187_v9, -inf }
 0x272   : > { %1407 = vmatpush.bf16.xpose.msra.mxu1 %v1389_v7 }
 0x275   : > { %1179 = vrot.lane.b32.xlu0 %v3045_v26, %s2714_s21  ;;  %v1080_v60 = vpop.f32.mrf.mxu1 }
 0x276   : > { %v3168_v54 = vsel %vm3019_vm15, %v1080_v60, -1e+30 }
 0x277   : > { %v1110_v51 = vsel %vm858_vm11, %v3168_v54, -inf }
 0x279   : > { %2243 = vmatmul.msk.bf16.vlgmr.msra.gmra.mxu1 %vm796_vm0, %v1361_v30 }
 0x27d   : > { %1177 = vrot.lane.b32.xlu0 %v3054_v29, %s2714_s21 }
 0x27e   : > { %v876_v55 = vpop.xlane.xlu0 %875 }
 0x27f   : > { %v888_v40 = vsub.f32 %v3074_v34, %v876_v55 }
 0x281   : > { %v901_v42 = vmul.f32 1.442695, %v888_v40 }
 0x283   : > { %2428 = vpow2.f32 %v901_v42  ;;  %v879_v45 = vpop.xlane.xlu1 %878 }
 0x284   : > { %v889_v61 = vsub.f32 %v3080_v37, %v879_v45  ;;  %v1101_v37 = vsel %vm858_vm11, %v3152_v52, -inf }
 0x286   : > { %v903_v0 = vmul.f32 1.442695, %v889_v61 }
 0x289   : > { %v3143_v57 = vpop.eup %2428  ;;  %v882_v58 = vpop.xlane.xlu2 %881 }
 0x28a   : > { %v890_v59 = vsub.f32 %v3086_v8, %v882_v58  ;;  %v933_v31 = vpack.c.bf16 %v3143_v57, %v3141_v44  ;;  %v1083_v8 = vpop.f32.mrf.mxu1 }
 0x28b   : > { %v3172_v3 = vsel %vm3048_vm7, %v1083_v8, -1e+30 }
 0x28c   : > { %2209 = vmatmul.msk.bf16.gmra.mxu0 %vm858_vm11, %v933_v31  ;;  %v905_v34 = vmul.f32 1.442695, %v890_v59  ;;  %v1113_v47 = vsel %vm858_vm11, %v3172_v3, -inf }
 0x28e   : > { %2430 = vpow2.f32 %v905_v34 }
 0x28f   : > { %2432 = vpow2.f32 %v903_v0 }
 0x291   : > { %v1654_v19 = vpop.permute.xlu0 %1653 }
 0x292   : > { %v1085_v5 = vpop.f32.mrf.mxu1 }
 0x293   : > { %v3183_v6 = vsel %vm2984_vm2, %v1085_v5, -1e+30 }
 0x294   : > { %v3162_v50 = vpop.eup %2430  ;;  %v1116_v10 = vsel %vm858_vm11, %v3183_v6, -inf }
 0x295   : > { %v3164_v1 = vpop.eup %2432 }
 0x296   : > { %1105 = vmax.xlane.f32.xlu1 %v1104_v49  ;;  %1102 = vmax.xlane.f32.xlu2 %v1101_v37  ;;  %v934_v4 = vpack.c.bf16 %v3162_v50, %v3164_v1 }
 0x299   : > { %v1656_v23 = vpop.permute.xlu0 %1655 }
 0x29b   : > { %v1652_v28 = vpop.permute.xlu1 %1651 }
 0x29c   : > { %2210 = vmatmul.msk.bf16.gmra.mxu0 %vm858_vm11, %v934_v4 }
 0x29e   : > { %1114 = vmax.xlane.f32.xlu1 %v1113_v47  ;;  %1111 = vmax.xlane.f32.xlu2 %v1110_v51 }
 0x2a6   : > { %1117 = vmax.xlane.f32.xlu2 %v1116_v10 }
 0x2a7   : > { %1108 = vmax.xlane.f32.xlu0 %v1107_v14 }
 0x2a8   : > { %v909_v63 = vpop.xlane.xlu2 %908 }
 0x2a9   : > { %2434 = vrcp.f32 %v909_v63 }
 0x2af   : > { %v2435_v18 = vpop.eup %2434 }
 0x2b0   : > { %v912_v17 = vpop.xlane.xlu2 %911 }
 0x2b1   : > { %2436 = vrcp.f32 %v912_v17 }
 0x2b7   : > { %1519 = vrot.lane.b32.xlu1 %v3024_v15, %s2715_s26  ;;  %v2437_v11 = vpop.eup %2436 }
 0x2b8   : > { %v1660_v20 = vpop.permute.xlu2 %1659 }
 0x2b9   : > { %v1680_v21 = vsel %vm796_vm0, %v1660_v20, 0 }
 0x2ba   : > { %1698 = vmatpush.bf16.xpose.msra.mxu0 %v1680_v21 }
 0x2bb   : > { %v980_v22 = vpop.f32.mrf.mxu0  ;;  %1515 = vrot.lane.b32.xlu0 %v3045_v26, %s2715_s26 }
 0x2bc   : > { %v1008_v32 = vmul.f32 %v2435_v18, %v980_v22 }
 0x2c0   : > { %v1363_v25 = vpop.permute.xlu2 %1362 }
 0x2c1   : > { %v1088_v12 = vpop.f32.mrf.mxu1  ;;  %2244 = vmatmul.msk.bf16.gmra.mxu1 %vm796_vm0, %v1363_v25 }
 0x2c2   : > { %v3214_v0 = vsel %vm3002_vm8, %v1088_v12, -1e+30 }
 0x2c3   : > { %v982_v2 = vpop.f32.mrf.mxu0  ;;  %1513 = vrot.lane.b32.xlu0 %v3054_v29, %s2715_s26  ;;  %v1119_v37 = vsel %vm858_vm11, %v3214_v0, -inf }
 0x2c4   : > { %v1009_v7 = vmul.f32 %v2437_v11, %v982_v2  ;;  %v915_v33 = vpop.xlane.xlu0 %914 }
 0x2c5   : > { %2438 = vrcp.f32 %v915_v33 }
 0x2c6   : > { %v1016_v30 = vpack.c.bf16 %v1009_v7, %v1008_v32  ;;  %v918_v38 = vpop.xlane.xlu1 %917 }
 0x2c7   : > { %2440 = vrcp.f32 %v918_v38 }
 0x2c8   : > { %2239 = vmatmul.msk.bf16.vlgmr.msrb.gmra.mxu0 %vm796_vm0, %v1016_v30  ;;  %v1365_v42 = vpop.permute.xlu2 %1364 }
 0x2c9   : > { %v1090_v35 = vpop.f32.mrf.mxu1 }
 0x2ca   : > { %v3204_v55 = vsel %vm3026_vm3, %v1090_v35, -1e+30 }
 0x2cb   : > { %v985_v40 = vpop.f32.mrf.mxu0  ;;  %1808 = vrot.lane.b32.xlu0 %v3038_v24, %s2716_s10  ;;  %v1122_v53 = vsel %vm858_vm11, %v3204_v55, -inf  ;;  %v2439_v45 = vpop.eup %2438 }
 0x2cc   : > { %1123 = vmax.xlane.f32.xlu2 %v1122_v53  ;;  %v1010_v31 = vmul.f32 %v2439_v45, %v985_v40 }
 0x2cd   : > { %v2441_v58 = vpop.eup %2440 }
 0x2d0   : > { %v1367_v49 = vpop.permute.xlu2 %1366 }
 0x2d1   : > { %2245 = vmatmul.msk.bf16.gmra.mxu1 %vm796_vm0, %v1365_v42 }
 0x2d3   : > { %v987_v59 = vpop.f32.mrf.mxu0 }
 0x2d4   : > { %v1011_v60 = vmul.f32 %v2441_v58, %v987_v59 }
 0x2d6   : > { %v1017_v61 = vpack.c.bf16 %v1011_v60, %v1010_v31 }
 0x2d7   : > { %v1184_v34 = vpop.permute.xlu0 %1183 }
 0x2d8   : > { %1205 = vmatpush.bf16.msrb.mxu2 %v1184_v34  ;;  %2334 = vmatpush.bf16.msrb.mxu3 %v1184_v34 }
 0x2d9   : > { %2240 = vmatmul.msk.bf16.gmra.mxu0 %vm796_vm0, %v1017_v61 }
 0x2de   : > { %v1658_v14 = vpop.permute.xlu1 %1657 }
 0x2df   : > { %v1182_v8 = vpop.permute.xlu0 %1181 }
 0x2e0   : > { %1206 = vmatpush.bf16.msrb.mxu2 %v1182_v8  ;;  %2335 = vmatpush.bf16.msrb.mxu3 %v1182_v8 }
 0x2e1   : > { %1120 = vmax.xlane.f32.xlu1 %v1119_v37  ;;  %2246 = vmatmul.msk.bf16.gmra.mxu1 %vm796_vm0, %v1367_v49 }
 0x2e4   : > { %1517 = vrot.lane.b32.xlu2 %v3038_v24, %s2715_s26  ;;  %s2656_s26 = scalar_lea.hbm %s3532_s4, 512 }
 0x2e5   : > { %p2658_p2 = scmp.lt.s32.totalorder %s2656_s26, %s2652_s19 }
 0x2e7   : > { %v1180_v4 = vpop.permute.xlu0 %1179  ;;  %p2659_p9 = por %p2658_p2, %p2657_p7 }
 0x2e8   : > { %1207 = vmatpush.bf16.msrb.mxu2 %v1180_v4  ;;  %2336 = vmatpush.bf16.msrb.mxu3 %v1180_v4 }
 0x2e9   : > { %2263 = vmatmul.msk.bf16.vlgmr.msra.gmra.mxu0 %vm796_vm0, %v1652_v28  ;;  %p2660_p10 = pnand %p2659_p9, %p2655_p8 }
 0x2ef   : > { %v1178_v47 = vpop.permute.xlu0 %1177 }
 0x2f0   : > { %1208 = vmatpush.bf16.msrb.mxu2 %v1178_v47  ;;  %2337 = vmatpush.bf16.msrb.mxu3 %v1178_v47 }
 0x2f6   : > { %v1409_v51 = vpop.f32.mrf.mxu1 }
 0x2f7   : > { %v3233_v63 = vsel %vm2965_vm10, %v1409_v51, -1e+30 }
 0x2f8   : > { %v1437_v22 = vsel %vm858_vm11, %v3233_v63, -inf }
 0x2f9   : > { %2264 = vmatmul.msk.bf16.gmra.mxu0 %vm796_vm0, %v1654_v19 }
 0x2fa   : > { %1810 = vrot.lane.b32.xlu1 %v3024_v15, %s2716_s10 }
 0x2fe   : > { %v1411_v5 = vpop.f32.mrf.mxu1 }
 0x2ff   : > { %v3227_v10 = vsel %vm2977_vm14, %v1411_v5, -1e+30 }
 0x300   : > { %v1440_v24 = vsel %vm858_vm11, %v3227_v10, -inf }
 0x301   : > { %1441 = vmax.xlane.f32.xlu0 %v1440_v24 }
 0x309   : > { %2265 = vmatmul.msk.bf16.gmra.mxu0 %vm796_vm0, %v1656_v23  ;;  %v1106_v17 = vpop.xlane.xlu1 %1105  ;;  %v1103_v15 = vpop.xlane.xlu2 %1102 }
 0x30a   : > { %v1126_v19 = vsub.f32 %v3156_v39, %v1106_v17  ;;  %v1125_v20 = vsub.f32 %v3152_v52, %v1103_v15  ;;  %v3252_v7 = vpop.f32.mrf.mxu0 }
 0x30c   : > { %v1135_v21 = vmul.f32 1.442695, %v1126_v19  ;;  %v1133_v25 = vmul.f32 1.442695, %v1125_v20 }
 0x30d   : > { %1438 = vmax.xlane.f32.xlu2 %v1437_v22 }
 0x30e   : > { %2442 = vpow2.f32 %v1135_v21 }
 0x30f   : > { %2444 = vpow2.f32 %v1133_v25 }
 0x311   : > { %v1112_v18 = vpop.xlane.xlu2 %1111  ;;  %v1115_v30 = vpop.xlane.xlu1 %1114 }
 0x312   : > { %v1128_v52 = vsub.f32 %v3168_v54, %v1112_v18  ;;  %v1129_v40 = vsub.f32 %v3172_v3, %v1115_v30  ;;  %v3262_v53 = vpop.f32.mrf.mxu0 }
 0x314   : > { %v3240_v12 = vpop.eup %2442  ;;  %v1139_v11 = vmul.f32 1.442695, %v1128_v52  ;;  %v1141_v45 = vmul.f32 1.442695, %v1129_v40 }
 0x315   : > { %v3242_v28 = vpop.eup %2444  ;;  %1806 = vrot.lane.b32.xlu0 %v3045_v26, %s2716_s10 }
 0x316   : > { %v1173_v39 = vpack.c.bf16 %v3240_v12, %v3242_v28  ;;  %2446 = vpow2.f32 %v1139_v11 }
 0x318   : > { %2215 = vmatmul.msk.bf16.vlgmr.msrb.gmra.mxu2 %vm858_vm11, %v1173_v39 }
 0x319   : > { %2266 = vmatmul.msk.bf16.gmra.mxu0 %vm796_vm0, %v1658_v14  ;;  %v1118_v26 = vpop.xlane.xlu2 %1117 }
 0x31a   : > { %v1109_v23 = vpop.xlane.xlu0 %1108  ;;  %v1130_v54 = vsub.f32 %v3183_v6, %v1118_v26  ;;  %v3265_v58 = vpop.f32.mrf.mxu0 }
 0x31b   : > { %v1127_v2 = vsub.f32 %v3187_v9, %v1109_v23 }
 0x31c   : > { %v3254_v33 = vpop.eup %2446  ;;  %v1143_v42 = vmul.f32 1.442695, %v1130_v54 }
 0x31d   : > { %v1137_v32 = vmul.f32 1.442695, %v1127_v2 }
 0x31f   : > { %2448 = vpow2.f32 %v1137_v32 }
 0x320   : > { %2450 = vpow2.f32 %v1143_v42 }
 0x321   : > { %2452 = vpow2.f32 %v1141_v45 }
 0x322   : > { %v3274_v3 = vpop.f32.mrf.mxu0 }
 0x325   : > { %v3256_v35 = vpop.eup %2448 }
 0x326   : > { %v1174_v38 = vpack.c.bf16 %v3254_v33, %v3256_v35  ;;  %v3267_v59 = vpop.eup %2450  ;;  %v1155_v62 = vsel %vm858_vm11, %v3256_v35, 0.0 }
 0x327   : > { %v3269_v6 = vpop.eup %2452  ;;  %v1164_v16 = vsel %vm858_vm11, %v3267_v59, 0.0 }
 0x328   : > { %2216 = vmatmul.msk.bf16.gmra.mxu2 %vm858_vm11, %v1174_v38  ;;  %v1175_v31 = vpack.c.bf16 %v3267_v59, %v3269_v6 }
 0x329   : > { %v1520_v9 = vpop.permute.xlu1 %1519 }
 0x32a   : > { %1541 = vmatpush.bf16.msra.mxu2 %v1520_v9 }
 0x32d   : > { %v1516_v49 = vpop.permute.xlu0 %1515 }
 0x335   : > { %v1514_v17 = vpop.permute.xlu0 %1513 }
 0x338   : > { %2217 = vmatmul.msk.bf16.gmra.mxu2 %vm858_vm11, %v1175_v31 }
 0x33d   : > { %v1809_v45 = vpop.permute.xlu0 %1808 }
 0x33e   : > { %v1414_v60 = vpop.f32.mrf.mxu1 }
 0x33f   : > { %v3278_v61 = vsel %vm2996_vm5, %v1414_v60, -1e+30  ;;  %v1124_v34 = vpop.xlane.xlu2 %1123 }
 0x340   : > { %v1443_v8 = vsel %vm858_vm11, %v3278_v61, -inf  ;;  %v1132_v15 = vsub.f32 %v3204_v55, %v1124_v34 }
 0x341   : > { %1444 = vmax.xlane.f32.xlu0 %v1443_v8 }
 0x342   : > { %v1147_v21 = vmul.f32 1.442695, %v1132_v15 }
 0x344   : > { %2454 = vpow2.f32 %v1147_v21 }
 0x345   : > { %v3282_v37 = vpop.f32.mrf.mxu0 }
 0x346   : > { %v1416_v4 = vpop.f32.mrf.mxu1 }
 0x347   : > { %v3286_v47 = vsel %vm3019_vm15, %v1416_v4, -1e+30  ;;  %v1518_v51 = vpop.permute.xlu2 %1517 }
 0x348   : > { %1542 = vmatpush.bf16.msra.mxu2 %v1518_v51  ;;  %v1446_v5 = vsel %vm858_vm11, %v3286_v47, -inf }
 0x349   : > { %1447 = vmax.xlane.f32.xlu2 %v1446_v5 }
 0x34a   : > { %v3304_v23 = vpop.eup %2454 }
 0x34b   : > { %v1170_v44 = vsel %vm858_vm11, %v3304_v23, 0.0 }
 0x34c   : > { %1543 = vmatpush.bf16.msra.mxu2 %v1516_v49 }
 0x34d   : > { %v3290_v24 = vpop.f32.mrf.mxu0 }
 0x34e   : > { %v1419_v14 = vpop.f32.mrf.mxu1 }
 0x34f   : > { %v3294_v19 = vsel %vm3048_vm7, %v1419_v14, -1e+30 }
 0x350   : > { %1544 = vmatpush.bf16.msra.mxu2 %v1514_v17  ;;  %v1449_v20 = vsel %vm858_vm11, %v3294_v19, -inf }
 0x351   : > { %1450 = vmax.xlane.f32.xlu2 %v1449_v20 }
 0x354   : > { %v1121_v22 = vpop.xlane.xlu1 %1120 }
 0x355   : > { %v1131_v25 = vsub.f32 %v3214_v0, %v1121_v22 }
 0x356   : > { %v3300_v18 = vpop.f32.mrf.mxu0  ;;  %v3302_v39 = vpop.f32.mrf.mxu1 }
 0x357   : > { %v1145_v52 = vmul.f32 1.442695, %v1131_v25 }
 0x359   : > { %2456 = vpow2.f32 %v1145_v52 }
 0x35e   : > { %v3306_v11 = vpop.f32.mrf.mxu0  ;;  %v1424_v55 = vpop.f32.mrf.mxu1 }
 0x35f   : > { %v3308_v2 = vpop.eup %2456  ;;  %v3312_v32 = vsel %vm3002_vm8, %v1424_v55, -1e+30 }
 0x360   : > { %v1455_v0 = vsel %vm858_vm11, %v3312_v32, -inf  ;;  %v1176_v30 = vpack.c.bf16 %v3304_v23, %v3308_v2  ;;  %v1167_v35 = vsel %vm858_vm11, %v3308_v2, 0.0 }
 0x361   : > { %1456 = vmax.xlane.f32.xlu0 %v1455_v0 }
 0x362   : > { %2218 = vmatmul.msk.bf16.vlgmr.msrb.gmra.mxu3 %vm858_vm11, %v1176_v30  ;;  %v1149_v30 = vsel %vm858_vm11, %v3242_v28, 0.0 }
 0x366   : > { %v1700_v26 = vpop.f32.mrf.mxu0  ;;  %v1426_v17 = vpop.f32.mrf.mxu1 }
 0x367   : > { %v3321_v54 = vsel %vm2965_vm10, %v1700_v26, -1e+30 }
 0x368   : > { %v1728_v38 = vsel %vm858_vm11, %v3321_v54, -inf }
 0x369   : > { %1729 = vmax.xlane.f32.xlu1 %v1728_v38 }
 0x36c   : > { %v1811_v40 = vpop.permute.xlu1 %1810 }
 0x36d   : > { %1832 = vmatpush.bf16.msrb.mxu1 %v1811_v40  ;;  %v1152_v40 = vsel %vm858_vm11, %v3240_v12, 0.0  ;;  %v3387_v12 = vsel %vm2984_vm2, %v3302_v39, -1e+30 }
 0x36e   : > { %v1702_v9 = vpop.f32.mrf.mxu0 }
 0x36f   : > { %v3327_v42 = vsel %vm2977_vm14, %v1702_v9, -1e+30 }
 0x370   : > { %v1731_v31 = vsel %vm858_vm11, %v3327_v42, -inf }
 0x371   : > { %1732 = vmax.xlane.f32.xlu2 %v1731_v31  ;;  %1833 = vmatpush.bf16.msrb.mxu1 %v1809_v45 }
 0x374   : > { %v1442_v8 = vpop.xlane.xlu0 %1441 }
 0x375   : > { %v1462_v43 = vsub.f32 %v3227_v10, %v1442_v8  ;;  %v3349_v10 = vsel %vm3026_vm3, %v1426_v17, -1e+30  ;;  %v922_v8 = vsel %vm858_vm11, %v3143_v57, 0.0  ;;  %v925_v57 = vsel %vm858_vm11, %v3164_v1, 0.0 }
 0x376   : > { %v1705_v36 = vpop.f32.mrf.mxu0 }
 0x377   : > { %v3333_v60 = vsel %vm2996_vm5, %v1705_v36, -1e+30  ;;  %v1471_v51 = vmul.f32 1.442695, %v1462_v43  ;;  %v1158_v36 = vsel %vm858_vm11, %v3254_v33, 0.0  ;;  %v1161_v33 = vsel %vm858_vm11, %v3269_v6, 0.0 }
 0x378   : > { %v1734_v34 = vsel %vm858_vm11, %v3333_v60, -inf  ;;  %v928_v43 = vsel %vm858_vm11, %v3162_v50, 0.0 }
 0x379   : > { %1735 = vmax.xlane.f32.xlu2 %v1734_v34  ;;  %2458 = vpow2.f32 %v1471_v51  ;;  %v1452_v34 = vsel %vm858_vm11, %v3387_v12, -inf }
 0x37e   : > { %v1707_v49 = vpop.f32.mrf.mxu0 }
 0x37f   : > { %v3340_v4 = vsel %vm3019_vm15, %v1707_v49, -1e+30  ;;  %v2459_v22 = vpop.eup %2458 }
 0x380   : > { %v1737_v5 = vsel %vm858_vm11, %v3340_v4, -inf  ;;  %v1439_v14 = vpop.xlane.xlu2 %1438  ;;  %v1488_v23 = vsel %vm858_vm11, %v2459_v22, 0.0 }
 0x381   : > { %1738 = vmax.xlane.f32.xlu2 %v1737_v5  ;;  %v1461_v48 = vsub.f32 %v3233_v63, %v1439_v14 }
 0x382   : > { %1804 = vrot.lane.b32.xlu1 %v3054_v29, %s2716_s10  ;;  %v1458_v29 = vsel %vm858_vm11, %v3349_v10, -inf }
 0x383   : > { %v1469_v15 = vmul.f32 1.442695, %v1461_v48 }
 0x385   : > { %2460 = vpow2.f32 %v1469_v15 }
 0x386   : > { %v1710_v13 = vpop.f32.mrf.mxu0 }
 0x387   : > { %v3353_v20 = vsel %vm3048_vm7, %v1710_v13, -1e+30  ;;  %v1807_v21 = vpop.permute.xlu0 %1806 }
 0x388   : > { %1834 = vmatpush.bf16.msrb.mxu1 %v1807_v21  ;;  %v1740_v63 = vsel %vm858_vm11, %v3353_v20, -inf }
 0x389   : > { %1741 = vmax.xlane.f32.xlu0 %v1740_v63  ;;  %1459 = vmax.xlane.f32.xlu2 %v1458_v29 }
 0x38b   : > { %v2461_v25 = vpop.eup %2460 }
 0x38c   : > { %v1509_v52 = vpack.c.bf16 %v2459_v22, %v2461_v25 }
 0x38e   : > { %v1712_v55 = vpop.f32.mrf.mxu0  ;;  %2247 = vmatmul.msk.bf16.vlgmr.msra.gmra.mxu2 %vm858_vm11, %v1509_v52 }
 0x38f   : > { %v3362_v27 = vsel %vm2984_vm2, %v1712_v55, -1e+30 }
 0x390   : > { %v1743_v0 = vsel %vm858_vm11, %v3362_v27, -inf }
 0x391   : > { %1744 = vmax.xlane.f32.xlu2 %v1743_v0  ;;  %1150 = vadd.xlane.f32.xlu0 %v1149_v30 }
 0x396   : > { %v1715_v26 = vpop.f32.mrf.mxu0 }
 0x397   : > { %v3370_v38 = vsel %vm3002_vm8, %v1715_v26, -1e+30 }
 0x398   : > { %v1746_v9 = vsel %vm858_vm11, %v3370_v38, -inf }
 0x399   : > { %1153 = vadd.xlane.f32.xlu2 %v1152_v40  ;;  %1747 = vmax.xlane.f32.xlu0 %v1746_v9 }
 0x39e   : > { %v1717_v45 = vpop.f32.mrf.mxu0 }
 0x39f   : > { %v3378_v31 = vsel %vm3026_vm3, %v1717_v45, -1e+30 }
 0x3a0   : > { %v1749_v28 = vsel %vm858_vm11, %v3378_v31, -inf }
 0x3a1   : > { %1750 = vmax.xlane.f32.xlu2 %v1749_v28  ;;  %1156 = vadd.xlane.f32.xlu0 %v1155_v62  ;;  %v2319_v28 = vld [vmem:[#allocation7 + $0x10] sm:$0xff] }
 0x3a9   : > { %1159 = vadd.xlane.f32.xlu2 %v1158_v36  ;;  %1165 = vadd.xlane.f32.xlu0 %v1164_v16 }
 0x3ac   : > { %1453 = vmax.xlane.f32.xlu1 %v1452_v34 }
 0x3b1   : > { %1168 = vadd.xlane.f32.xlu2 %v1167_v35  ;;  %920 = vadd.xlane.f32.xlu0 %v919_v46 }
 0x3b4   : > { %1162 = vadd.xlane.f32.xlu1 %v1161_v33  ;;  %v1445_v39 = vpop.xlane.xlu0 %1444 }
 0x3b5   : > { %v1463_v59 = vsub.f32 %v3278_v61, %v1445_v39  ;;  %v1485_v61 = vsel %vm858_vm11, %v2461_v25, 0.0 }
 0x3b7   : > { %v1473_v2 = vmul.f32 1.442695, %v1463_v59 }
 0x3b9   : > { %923 = vadd.xlane.f32.xlu2 %v922_v8  ;;  %929 = vadd.xlane.f32.xlu0 %v928_v43  ;;  %2462 = vpow2.f32 %v1473_v2 }
 0x3bc   : > { %1171 = vadd.xlane.f32.xlu1 %v1170_v44  ;;  %v1448_v49 = vpop.xlane.xlu2 %1447  ;;  %v1210_v44 = vpop.f32.mrf.mxu2 }
 0x3bd   : > { %v1464_v6 = vsub.f32 %v3286_v47, %v1448_v49 }
 0x3bf   : > { %v1475_v51 = vmul.f32 1.442695, %v1464_v6  ;;  %v2463_v50 = vpop.eup %2462 }
 0x3c0   : > { %v1491_v47 = vsel %vm858_vm11, %v2463_v50, 0.0 }
 0x3c1   : > { %2464 = vpow2.f32 %v1475_v51  ;;  %1486 = vadd.xlane.f32.xlu2 %v1485_v61 }
 0x3c4   : > { %926 = vadd.xlane.f32.xlu1 %v925_v57  ;;  %v1451_v48 = vpop.xlane.xlu2 %1450 }
 0x3c5   : > { %v1465_v29 = vsub.f32 %v3294_v19, %v1451_v48 }
 0x3c7   : > { %v2465_v5 = vpop.eup %2464  ;;  %v1477_v22 = vmul.f32 1.442695, %v1465_v29 }
 0x3c8   : > { %v1510_v14 = vpack.c.bf16 %v2465_v5, %v2463_v50  ;;  %v1494_v26 = vsel %vm858_vm11, %v2465_v5, 0.0 }
 0x3ca   : > { %2248 = vmatmul.msk.bf16.gmra.mxu2 %vm858_vm11, %v1510_v14 }
 0x3cc   : > { %1489 = vadd.xlane.f32.xlu1 %v1488_v23 }
 0x3d4   : > { %1492 = vadd.xlane.f32.xlu1 %v1491_v47  ;;  %v3422_v19 = vpop.xlane.xlu0 %1456 }
 0x3dc   : > { %v1730_v17 = vpop.xlane.xlu1 %1729 }
 0x3dd   : > { %v1752_v15 = vsub.f32 %v3321_v54, %v1730_v17 }
 0x3df   : > { %v1760_v13 = vmul.f32 1.442695, %v1752_v15 }
 0x3e1   : > { %2466 = vpow2.f32 %v1760_v13 }
 0x3e4   : > { %v1733_v21 = vpop.xlane.xlu2 %1732 }
 0x3e5   : > { %v1753_v1 = vsub.f32 %v3327_v42, %v1733_v21  ;;  %v2320_v42 = vld [vmem:[#allocation7 + $0x18] sm:$0xff] }
 0x3e6   : > { %1284 = vmatpush.bf16.msra.mxu3 %v2320_v42  ;;  %v1467_v42 = vsub.f32 %v3312_v32, %v3422_v19 }
 0x3e7   : > { %v2467_v63 = vpop.eup %2466  ;;  %v1762_v25 = vmul.f32 1.442695, %v1753_v1 }
 0x3e8   : > { %v1776_v52 = vsel %vm858_vm11, %v2467_v63, 0.0 }
 0x3e9   : > { %2468 = vpow2.f32 %v1762_v25  ;;  %1777 = vadd.xlane.f32.xlu0 %v1776_v52 }
 0x3ea   : > { %2470 = vpow2.f32 %v1477_v22  ;;  %1285 = vmatpush.bf16.msra.mxu3 %v2319_v28 }
 0x3ec   : > { %v1736_v55 = vpop.xlane.xlu2 %1735 }
 0x3ed   : > { %v1754_v0 = vsub.f32 %v3333_v60, %v1736_v55 }
 0x3ee   : > { %2338 = vmatpush.bf16.msrb.mxu3 %v3092_v41 }
 0x3ef   : > { %v2469_v30 = vpop.eup %2468  ;;  %v1764_v54 = vmul.f32 1.442695, %v1754_v0 }
 0x3f0   : > { %v1779_v40 = vsel %vm858_vm11, %v2469_v30, 0.0  ;;  %v3424_v62 = vpop.eup %2470  ;;  %v1800_v36 = vpack.c.bf16 %v2469_v30, %v2467_v63 }
 0x3f1   : > { %2472 = vpow2.f32 %v1764_v54  ;;  %1495 = vadd.xlane.f32.xlu0 %v1494_v26  ;;  %1780 = vadd.xlane.f32.xlu2 %v1779_v40  ;;  %v1497_v35 = vsel %vm858_vm11, %v3424_v62, 0.0 }
 0x3f2   : > { %2339 = vmatpush.bf16.msrb.mxu3 %v3100_v56 }
 0x3f4   : > { %v1805_v9 = vpop.permute.xlu1 %1804  ;;  %v1739_v45 = vpop.xlane.xlu2 %1738 }
 0x3f5   : > { %v1755_v60 = vsub.f32 %v3340_v4, %v1739_v45  ;;  %1835 = vmatpush.bf16.msrb.mxu1 %v1805_v9 }
 0x3f7   : > { %v2473_v16 = vpop.eup %2472  ;;  %v1766_v34 = vmul.f32 1.442695, %v1755_v60 }
 0x3f8   : > { %2267 = vmatmul.msk.bf16.vlgmr.msrb.gmra.mxu1 %vm858_vm11, %v1800_v36  ;;  %v1782_v46 = vsel %vm858_vm11, %v2473_v16, 0.0  ;;  %v1481_v36 = vmul.f32 1.442695, %v1467_v42 }
 0x3f9   : > { %2474 = vpow2.f32 %v1766_v34  ;;  %1498 = vadd.xlane.f32.xlu0 %v1497_v35  ;;  %1783 = vadd.xlane.f32.xlu2 %v1782_v46 }
 0x3fc   : > { %v1742_v4 = vpop.xlane.xlu0 %1741  ;;  %v1460_v33 = vpop.xlane.xlu2 %1459 }
 0x3fd   : > { %v1756_v39 = vsub.f32 %v3353_v20, %v1742_v4  ;;  %v1468_v41 = vsub.f32 %v3349_v10, %v1460_v33  ;;  %v1212_v10 = vpop.f32.mrf.mxu2 }
 0x3ff   : > { %v2475_v59 = vpop.eup %2474  ;;  %v1768_v8 = vmul.f32 1.442695, %v1756_v39  ;;  %v1483_v2 = vmul.f32 1.442695, %v1468_v41 }
 0x400   : > { %v1785_v43 = vsel %vm858_vm11, %v2475_v59, 0.0  ;;  %v1801_v61 = vpack.c.bf16 %v2475_v59, %v2473_v16 }
 0x401   : > { %2476 = vpow2.f32 %v1768_v8  ;;  %1786 = vadd.xlane.f32.xlu1 %v1785_v43 }
 0x402   : > { %2478 = vpow2.f32 %v1483_v2 }
 0x404   : > { %v1151_v49 = vpop.xlane.xlu0 %1150  ;;  %v1745_v6 = vpop.xlane.xlu2 %1744 }
 0x405   : > { %v1757_v51 = vsub.f32 %v3362_v27, %v1745_v6  ;;  %v1215_v25 = vpop.f32.mrf.mxu2 }
 0x407   : > { %v2477_v56 = vpop.eup %2476  ;;  %v1770_v57 = vmul.f32 1.442695, %v1757_v51 }
 0x408   : > { %2268 = vmatmul.msk.bf16.gmra.mxu1 %vm858_vm11, %v1801_v61  ;;  %v1788_v20 = vsel %vm858_vm11, %v2477_v56, 0.0  ;;  %v3439_v14 = vpop.eup %2478  ;;  %v1225_v61 = vpop.f32.mrf.mxu3 }
 0x409   : > { %2480 = vpow2.f32 %v1770_v57  ;;  %1789 = vadd.xlane.f32.xlu1 %v1788_v20  ;;  %v1506_v48 = vsel %vm858_vm11, %v3439_v14, 0.0  ;;  %v2324_v20 = vld [vmem:[#allocation7 + $0x38] sm:$0xff] }
 0x40a   : > { %2482 = vrcp.f32 %v1151_v49  ;;  %1911 = vmatpush.bf16.msrb.mxu2 %v2324_v20 }
 0x40c   : > { %v1748_v50 = vpop.xlane.xlu0 %1747  ;;  %v1154_v5 = vpop.xlane.xlu2 %1153 }
 0x40d   : > { %v1758_v23 = vsub.f32 %v3370_v38, %v1748_v50  ;;  %2484 = vrcp.f32 %v1154_v5  ;;  %v1217_v40 = vpop.f32.mrf.mxu2 }
 0x40f   : > { %v2481_v27 = vpop.eup %2480  ;;  %v1772_v47 = vmul.f32 1.442695, %v1758_v23 }
 0x410   : > { %v1791_v17 = vsel %vm858_vm11, %v2481_v27, 0.0  ;;  %v2483_v15 = vpop.eup %2482  ;;  %v1802_v52 = vpack.c.bf16 %v2481_v27, %v2477_v56  ;;  %v1227_v5 = vpop.f32.mrf.mxu3 }
 0x411   : > { %2486 = vpow2.f32 %v1772_v47  ;;  %1507 = vadd.xlane.f32.xlu1 %v1506_v48  ;;  %1792 = vadd.xlane.f32.xlu0 %v1791_v17  ;;  %v1238_v21 = vmul.f32 %v2483_v15, %v1210_v44  ;;  %v2322_v15 = vld [vmem:[#allocation7 + $0x28] sm:$0xff] }
 0x413   : > { %v2485_v13 = vpop.eup %2484 }
 0x414   : > { %v1239_v1 = vmul.f32 %v2485_v13, %v1212_v10  ;;  %v1751_v63 = vpop.xlane.xlu2 %1750  ;;  %v1157_v0 = vpop.xlane.xlu0 %1156 }
 0x415   : > { %v1759_v29 = vsub.f32 %v3378_v31, %v1751_v63  ;;  %2488 = vrcp.f32 %v1157_v0  ;;  %v1220_v39 = vpop.f32.mrf.mxu2 }
 0x416   : > { %v1246_v38 = vpack.c.bf16 %v1239_v1, %v1238_v21  ;;  %v2321_v1 = vld [vmem:[#allocation7 + $0x20] sm:$0xff] }
 0x417   : > { %v2487_v22 = vpop.eup %2486  ;;  %v1774_v30 = vmul.f32 1.442695, %v1759_v29 }
 0x418   : > { %2227 = vmatmul.msk.bf16.vlgmr.msra.gmra.mxu3 %vm796_vm0, %v1246_v38  ;;  %2269 = vmatmul.msk.bf16.gmra.mxu1 %vm858_vm11, %v1802_v52  ;;  %v1794_v55 = vsel %vm858_vm11, %v2487_v22, 0.0  ;;  %v2323_v52 = vld [vmem:[#allocation7 + $0x30] sm:$0xff] }
 0x419   : > { %1795 = vadd.xlane.f32.xlu0 %v1794_v55  ;;  %2490 = vpow2.f32 %v1774_v30  ;;  %1620 = vmatpush.bf16.msra.mxu3 %v2322_v15 }
 0x41a   : > { %1912 = vmatpush.bf16.msrb.mxu2 %v2323_v52 }
 0x41b   : > { %v2489_v9 = vpop.eup %2488 }
 0x41c   : > { %v1160_v54 = vpop.xlane.xlu2 %1159  ;;  %v1240_v16 = vmul.f32 %v2489_v9, %v1215_v25  ;;  %v1166_v33 = vpop.xlane.xlu0 %1165 }
 0x41d   : > { %2492 = vrcp.f32 %v1160_v54  ;;  %v1222_v2 = vpop.f32.mrf.mxu2  ;;  %1621 = vmatpush.bf16.msra.mxu3 %v2321_v1 }
 0x41f   : > { %v1454_v26 = vpop.xlane.xlu1 %1453  ;;  %v2491_v28 = vpop.eup %2490 }
 0x420   : > { %v1466_v31 = vsub.f32 %v3387_v12, %v1454_v26  ;;  %v1803_v35 = vpack.c.bf16 %v2491_v28, %v2487_v22 }
 0x422   : > { %v1479_v45 = vmul.f32 1.442695, %v1466_v31 }
 0x423   : > { %v2493_v60 = vpop.eup %2492 }
 0x424   : > { %2494 = vpow2.f32 %v1479_v45  ;;  %v1241_v34 = vmul.f32 %v2493_v60, %v1217_v40  ;;  %v1169_v56 = vpop.xlane.xlu2 %1168  ;;  %v921_v17 = vpop.xlane.xlu0 %920 }
 0x425   : > { %2496 = vpow2.f32 %v1481_v36 }
 0x426   : > { %v1247_v4 = vpack.c.bf16 %v1241_v34, %v1240_v16 }
 0x427   : > { %v1163_v46 = vpop.xlane.xlu1 %1162 }
 0x428   : > { %2270 = vmatmul.msk.bf16.gmra.mxu1 %vm858_vm11, %v1803_v35  ;;  %2228 = vmatmul.msk.bf16.gmra.mxu3 %vm796_vm0, %v1247_v4  ;;  %2498 = vrcp.f32 %v1163_v46 }
 0x429   : > { %2500 = vrcp.f32 %v1166_v33 }
 0x42a   : > { %v2495_v12 = vpop.eup %2494 }
 0x42b   : > { %v1500_v32 = vsel %vm858_vm11, %v2495_v12, 0.0  ;;  %v1511_v19 = vpack.c.bf16 %v2495_v12, %v3424_v62  ;;  %v2497_v59 = vpop.eup %2496  ;;  %v1797_v62 = vsel %vm858_vm11, %v2491_v28, 0.0 }
 0x42c   : > { %1501 = vadd.xlane.f32.xlu2 %v1500_v32  ;;  %v1503_v43 = vsel %vm858_vm11, %v2497_v59, 0.0  ;;  %v1512_v57 = vpack.c.bf16 %v3439_v14, %v2497_v59  ;;  %v924_v47 = vpop.xlane.xlu2 %923  ;;  %v930_v38 = vpop.xlane.xlu0 %929 }
 0x42d   : > { %2249 = vmatmul.msk.bf16.gmra.mxu2 %vm858_vm11, %v1511_v19 }
 0x42e   : > { %v2499_v8 = vpop.eup %2498 }
 0x42f   : > { %v2501_v41 = vpop.eup %2500  ;;  %v1242_v44 = vmul.f32 %v2499_v8, %v1220_v39  ;;  %v1172_v6 = vpop.xlane.xlu1 %1171 }
 0x430   : > { %v1243_v49 = vmul.f32 %v2501_v41, %v1222_v2  ;;  %2502 = vrcp.f32 %v1172_v6 }
 0x431   : > { %2504 = vrcp.f32 %v1169_v56 }
 0x432   : > { %v1248_v51 = vpack.c.bf16 %v1243_v49, %v1242_v44  ;;  %2506 = vrcp.f32 %v924_v47 }
 0x433   : > { %2508 = vrcp.f32 %v921_v17 }
 0x434   : > { %1504 = vadd.xlane.f32.xlu2 %v1503_v43 }
 0x436   : > { %v2503_v10 = vpop.eup %2502 }
 0x437   : > { %v2505_v50 = vpop.eup %2504  ;;  %v1245_v23 = vmul.f32 %v2503_v10, %v1227_v5  ;;  %v927_v25 = vpop.xlane.xlu1 %926 }
 0x438   : > { %2229 = vmatmul.msk.bf16.gmra.mxu3 %vm796_vm0, %v1248_v51  ;;  %v1244_v27 = vmul.f32 %v2505_v50, %v1225_v61  ;;  %v2507_v14 = vpop.eup %2506  ;;  %2510 = vrcp.f32 %v927_v25 }
 0x439   : > { %v2509_v13 = vpop.eup %2508  ;;  %v1013_v21 = vmul.f32 %v2507_v14, %v3262_v53  ;;  %2512 = vrcp.f32 %v930_v38  ;;  %v1546_v53 = vpop.f32.mrf.mxu2 }
 0x43a   : > { %v1249_v48 = vpack.c.bf16 %v1245_v23, %v1244_v27  ;;  %v1012_v63 = vmul.f32 %v2509_v13, %v3252_v7  ;;  %v1487_v7 = vpop.xlane.xlu2 %1486 }
 0x43c   : > { %1798 = vadd.xlane.f32.xlu2 %v1797_v62  ;;  %v1018_v29 = vpack.c.bf16 %v1013_v21, %v1012_v63 }
 0x43d   : > { %2250 = vmatmul.msk.bf16.gmra.mxu2 %vm858_vm11, %v1512_v57 }
 0x43e   : > { %v2511_v22 = vpop.eup %2510 }
 0x43f   : > { %v2513_v55 = vpop.eup %2512  ;;  %v1014_v0 = vmul.f32 %v2511_v22, %v3265_v58  ;;  %v1490_v54 = vpop.xlane.xlu1 %1489 }
 0x440   : > { %v1015_v30 = vmul.f32 %v2513_v55, %v3274_v3  ;;  %2514 = vrcp.f32 %v1490_v54 }
 0x441   : > { %2516 = vrcp.f32 %v1487_v7  ;;  %v1548_v42 = vpop.f32.mrf.mxu2 }
 0x442   : > { %v1019_v26 = vpack.c.bf16 %v1015_v30, %v1014_v0 }
 0x446   : > { %v2515_v31 = vpop.eup %2514 }
 0x447   : > { %v2517_v9 = vpop.eup %2516  ;;  %v1575_v45 = vmul.f32 %v2515_v31, %v1548_v42  ;;  %v1493_v34 = vpop.xlane.xlu1 %1492 }
 0x448   : > { %2230 = vmatmul.msk.bf16.gmra.mxu3 %vm796_vm0, %v1249_v48  ;;  %v1574_v60 = vmul.f32 %v2517_v9, %v1546_v53 }
 0x44a   : > { %v1582_v58 = vpack.c.bf16 %v1575_v45, %v1574_v60 }
 0x44d   : > { %v1551_v3 = vpop.f32.mrf.mxu2 }
 0x455   : > { %v1553_v59 = vpop.f32.mrf.mxu2 }
 0x458   : > { %2241 = vmatmul.msk.bf16.vlgmr.msrb.gmra.mxu3 %vm796_vm0, %v1018_v29 }
 0x45c   : > { %v1778_v40 = vpop.xlane.xlu0 %1777 }
 0x45d   : > { %2518 = vrcp.f32 %v1778_v40 }
 0x463   : > { %v2519_v35 = vpop.eup %2518 }
 0x464   : > { %v1781_v28 = vpop.xlane.xlu2 %1780  ;;  %v1496_v16 = vpop.xlane.xlu0 %1495 }
 0x465   : > { %2520 = vrcp.f32 %v1781_v28 }
 0x466   : > { %2522 = vrcp.f32 %v1496_v16 }
 0x467   : > { %2524 = vrcp.f32 %v1493_v34 }
 0x468   : > { %2242 = vmatmul.msk.bf16.gmra.mxu3 %vm796_vm0, %v1019_v26 }
 0x46b   : > { %v2521_v46 = vpop.eup %2520 }
 0x46c   : > { %v2523_v39 = vpop.eup %2522  ;;  %v1784_v41 = vpop.xlane.xlu2 %1783 }
 0x46d   : > { %v2525_v19 = vpop.eup %2524  ;;  %v1577_v8 = vmul.f32 %v2523_v39, %v1553_v59  ;;  %2526 = vrcp.f32 %v1784_v41  ;;  %v1499_v51 = vpop.xlane.xlu0 %1498 }
 0x46e   : > { %v1576_v44 = vmul.f32 %v2525_v19, %v1551_v3 }
 0x470   : > { %v1583_v49 = vpack.c.bf16 %v1577_v8, %v1576_v44 }
 0x473   : > { %v2527_v6 = vpop.eup %2526 }
 0x474   : > { %v1787_v43 = vpop.xlane.xlu1 %1786 }
 0x475   : > { %v1837_v36 = vpop.f32.mrf.mxu1  ;;  %2528 = vrcp.f32 %v1787_v43 }
 0x476   : > { %v1865_v33 = vmul.f32 %v2519_v35, %v1837_v36 }
 0x478   : > { %2259 = vmatmul.msk.bf16.vlgmr.msra.gmra.mxu3 %vm796_vm0, %v1582_v58 }
 0x47b   : > { %v2529_v61 = vpop.eup %2528 }
 0x47c   : > { %v1790_v10 = vpop.xlane.xlu1 %1789 }
 0x47d   : > { %v1839_v4 = vpop.f32.mrf.mxu1  ;;  %2530 = vrcp.f32 %v1790_v10 }
 0x47e   : > { %v1866_v12 = vmul.f32 %v2521_v46, %v1839_v4 }
 0x480   : > { %v1873_v32 = vpack.c.bf16 %v1866_v12, %v1865_v33 }
 0x482   : > { %2279 = vmatmul.msk.bf16.vlgmr.msrb.gmra.mxu2 %vm796_vm0, %v1873_v32 }
 0x483   : > { %v2531_v27 = vpop.eup %2530 }
 0x484   : > { %v1793_v50 = vpop.xlane.xlu0 %1792  ;;  %v1508_v60 = vpop.xlane.xlu1 %1507 }
 0x485   : > { %v1842_v2 = vpop.f32.mrf.mxu1  ;;  %2532 = vrcp.f32 %v1793_v50 }
 0x486   : > { %v1867_v62 = vmul.f32 %v2527_v6, %v1842_v2 }
 0x488   : > { %2260 = vmatmul.msk.bf16.gmra.mxu3 %vm796_vm0, %v1583_v49 }
 0x48b   : > { %v2533_v47 = vpop.eup %2532 }
 0x48c   : > { %v1796_v63 = vpop.xlane.xlu0 %1795 }
 0x48d   : > { %v1844_v56 = vpop.f32.mrf.mxu1  ;;  %2534 = vrcp.f32 %v1796_v63 }
 0x48e   : > { %v1868_v57 = vmul.f32 %v2529_v61, %v1844_v56 }
 0x490   : > { %v1874_v20 = vpack.c.bf16 %v1868_v57, %v1867_v62 }
 0x492   : > { %2280 = vmatmul.msk.bf16.gmra.mxu2 %vm796_vm0, %v1874_v20 }
 0x493   : > { %v2535_v55 = vpop.eup %2534 }
 0x495   : > { %v1847_v5 = vpop.f32.mrf.mxu1 }
 0x496   : > { %v1869_v17 = vmul.f32 %v2531_v27, %v1847_v5 }
 0x49b   : > { %v1287_v23 = vpop.f32.mrf.mxu3 }
 0x49c   : > { %v1341_v49 = vadd.f32 %v3282_v37, %v1287_v23 }
 0x49d   : > { %v1849_v48 = vpop.f32.mrf.mxu1 }
 0x49e   : > { %v1870_v15 = vmul.f32 %v2533_v47, %v1849_v48 }
 0x49f   : > { %v1502_v14 = vpop.xlane.xlu2 %1501 }
 0x4a0   : > { %v1875_v13 = vpack.c.bf16 %v1870_v15, %v1869_v17 }
 0x4a2   : > { %2281 = vmatmul.msk.bf16.gmra.mxu2 %vm796_vm0, %v1875_v13 }
 0x4a3   : > { %v1289_v21 = vpop.f32.mrf.mxu3 }
 0x4a4   : > { %v1343_v20 = vadd.f32 %v3290_v24, %v1289_v21 }
 0x4a5   : > { %v1852_v29 = vpop.f32.mrf.mxu1 }
 0x4a6   : > { %v1871_v54 = vmul.f32 %v2535_v55, %v1852_v29 }
 0x4a7   : > { %v1505_v1 = vpop.xlane.xlu2 %1504 }
 0x4ab   : > { %v1292_v25 = vpop.f32.mrf.mxu3 }
 0x4ac   : > { %v1346_v27 = vadd.f32 %v3300_v18, %v1292_v25 }
 0x4ad   : > { %v1854_v30 = vpop.f32.mrf.mxu1 }
 0x4af   : > { %v1799_v38 = vpop.xlane.xlu2 %1798 }
 0x4b0   : > { %2536 = vrcp.f32 %v1799_v38  ;;  %v1556_v52 = vpop.f32.mrf.mxu2 }
 0x4b1   : > { %2538 = vrcp.f32 %v1499_v51  ;;  %v2417_v51 = vld [vmem:[%s3531_s3] ss:$0 sm:$0xff] }
 0x4b2   : > { %2540 = vrcp.f32 %v1502_v14 }
 0x4b3   : > { %v1294_v22 = vpop.f32.mrf.mxu3  ;;  %2542 = vrcp.f32 %v1508_v60 }
 0x4b4   : > { %2544 = vrcp.f32 %v1505_v1  ;;  %v1348_v14 = vadd.f32 %v3306_v11, %v1294_v22 }
 0x4b6   : > { %v2537_v0 = vpop.eup %2536 }
 0x4b7   : > { %v2539_v53 = vpop.eup %2538  ;;  %v1872_v26 = vmul.f32 %v2537_v0, %v1854_v30 }
 0x4b8   : > { %v2541_v7 = vpop.eup %2540  ;;  %v1558_v40 = vpop.f32.mrf.mxu2  ;;  %v1578_v31 = vmul.f32 %v2539_v53, %v1556_v52 }
 0x4b9   : > { %v1579_v42 = vmul.f32 %v2541_v7, %v1558_v40  ;;  %v1876_v9 = vpack.c.bf16 %v1872_v26, %v1871_v54  ;;  %v2543_v16 = vpop.eup %2542 }
 0x4ba   : > { %v2545_v3 = vpop.eup %2544 }
 0x4bb   : > { %v1584_v45 = vpack.c.bf16 %v1579_v42, %v1578_v31  ;;  %2282 = vmatmul.msk.bf16.gmra.mxu2 %vm796_vm0, %v1876_v9  ;;  %v1297_v28 = vpop.f32.mrf.mxu3 }
 0x4bd   : > { %2261 = vmatmul.msk.bf16.gmra.mxu3 %vm796_vm0, %v1584_v45 }
 0x4c0   : > { %v1561_v36 = vpop.f32.mrf.mxu2 }
 0x4c1   : > { %v1580_v35 = vmul.f32 %v2545_v3, %v1561_v36 }
 0x4c3   : > { %v1299_v58 = vpop.f32.mrf.mxu3 }
 0x4c8   : > { %v1563_v34 = vpop.f32.mrf.mxu2 }
 0x4c9   : > { %v1581_v46 = vmul.f32 %v2543_v16, %v1563_v34 }
 0x4cb   : > { %v1585_v4 = vpack.c.bf16 %v1581_v46, %v1580_v35  ;;  %v1302_v33 = vpop.f32.mrf.mxu3 }
 0x4cd   : > { %2262 = vmatmul.msk.bf16.gmra.mxu3 %vm796_vm0, %v1585_v4 }
 0x4d3   : > { %v1304_v12 = vpop.f32.mrf.mxu3 }
 0x4db   : > { %v1350_v39 = vpop.f32.mrf.mxu3 }
 0x4dc   : > { %v1351_v32 = vadd.f32 %v1350_v39, %v1297_v28 }
 0x4e3   : > { %v1352_v19 = vpop.f32.mrf.mxu3 }
 0x4e4   : > { %v1353_v59 = vadd.f32 %v1352_v19, %v1299_v58 }
 0x4eb   : > { %v1355_v8 = vpop.f32.mrf.mxu3 }
 0x4ec   : > { %v1356_v41 = vadd.f32 %v1355_v8, %v1302_v33 }
 0x4f3   : > { %v1357_v43 = vpop.f32.mrf.mxu3 }
 0x4f4   : > { %v1358_v44 = vadd.f32 %v1357_v43, %v1304_v12 }
 0x4fb   : > { %v1623_v2 = vpop.f32.mrf.mxu3 }
 0x4fc   : > { %v1643_v6 = vadd.f32 %v1623_v2, %v1341_v49 }
 0x503   : > { %v1625_v61 = vpop.f32.mrf.mxu3 }
 0x504   : > { %v1644_v10 = vadd.f32 %v1625_v61, %v1343_v20 }
 0x505   : > { %v1914_v56 = vpop.f32.mrf.mxu2 }
 0x506   : > { %v1934_v62 = vadd.f32 %v1914_v56, %v1643_v6 }
 0x508   : > { %v1946_v57 = vadd.f32 %v2417_v51, %v1934_v62 }
 0x50a   : > { %1954 = vst [vmem:[%s3483_s8] sm:$0xff] %v1946_v57 }
 0x50b   : > { %v1628_v5 = vpop.f32.mrf.mxu3 }
 0x50c   : > { %v1645_v47 = vadd.f32 %v1628_v5, %v1346_v27 }
 0x50d   : > { %v1916_v37 = vpop.f32.mrf.mxu2 }
 0x50e   : > { %v1935_v50 = vadd.f32 %v1916_v37, %v1644_v10 }
 0x510   : > { %v1947_v23 = vadd.f32 %v2417_v51, %v1935_v50 }
 0x512   : > { %1955 = vst [vmem:[%s3483_s8 + $0x8] sm:$0xff] %v1947_v23 }
 0x513   : > { %v1630_v15 = vpop.f32.mrf.mxu3 }
 0x514   : > { %v1646_v13 = vadd.f32 %v1630_v15, %v1348_v14 }
 0x515   : > { %v1919_v48 = vpop.f32.mrf.mxu2 }
 0x516   : > { %v1936_v17 = vadd.f32 %v1919_v48, %v1645_v47 }
 0x518   : > { %v1948_v24 = vadd.f32 %v2417_v51, %v1936_v17 }
 0x51a   : > { %1956 = vst [vmem:[%s3483_s8 + $0x10] sm:$0xff] %v1948_v24 }
 0x51d   : > { %v1921_v21 = vpop.f32.mrf.mxu2 }
 0x51e   : > { %v1937_v1 = vadd.f32 %v1921_v21, %v1646_v13 }
 0x520   : > { %v1949_v63 = vadd.f32 %v2417_v51, %v1937_v1 }
 0x522   : > { %1957 = vst [vmem:[%s3483_s8 + $0x18] sm:$0xff] %v1949_v63 }
 0x525   : > { %v1924_v29 = vpop.f32.mrf.mxu2 }
 0x52d   : > { %v1926_v55 = vpop.f32.mrf.mxu2 }
 0x53e   : > { %v1929_v53 = vpop.f32.mrf.mxu2 }
 0x540   : > { %v1633_v38 = vpop.f32.mrf.mxu3 }
 0x541   : > { %v1647_v18 = vadd.f32 %v1633_v38, %v1351_v32 }
 0x543   : > { %v1938_v25 = vadd.f32 %v1924_v29, %v1647_v18 }
 0x545   : > { %v1950_v52 = vadd.f32 %v2417_v51, %v1938_v25 }
 0x546   : > { %v1931_v9 = vpop.f32.mrf.mxu2 }
 0x547   : > { %1958 = vst [vmem:[%s3483_s8 + $0x20] sm:$0xff] %v1950_v52 }
 0x548   : > { %v1635_v0 = vpop.f32.mrf.mxu3 }
 0x549   : > { %v1648_v30 = vadd.f32 %v1635_v0, %v1353_v59 }
 0x54b   : > { %v1939_v11 = vadd.f32 %v1926_v55, %v1648_v30 }
 0x54d   : > { %v1951_v22 = vadd.f32 %v2417_v51, %v1939_v11 }
 0x54f   : > { %1959 = vst [vmem:[%s3483_s8 + $0x28] sm:$0xff] %v1951_v22 }
 0x550   : > { %v1638_v54 = vpop.f32.mrf.mxu3 }
 0x551   : > { %v1649_v26 = vadd.f32 %v1638_v54, %v1356_v41 }
 0x553   : > { %v1940_v7 = vadd.f32 %v1929_v53, %v1649_v26 }
 0x555   : > { %v1952_v40 = vadd.f32 %v2417_v51, %v1940_v7 }
 0x557   : > { %1960 = vst [vmem:[%s3483_s8 + $0x30] sm:$0xff] %v1952_v40 }
 0x558   : > { %v1640_v31 = vpop.f32.mrf.mxu3 }
 0x559   : > { %v1650_v42 = vadd.f32 %v1640_v31, %v1358_v44 }
 0x55b   : > { %v1941_v45 = vadd.f32 %v1931_v9, %v1650_v42 }
 0x55d   : > { %v1953_v28 = vadd.f32 %v2417_v51, %v1941_v45 }
 0x55f   : > { %1961 = vst [vmem:[%s3483_s8 + $0x38] sm:$0xff] %v1953_v28 }
 0x560   : > { %2663 = shalt.err (!%p2660_p10)
}
 0x561   : > { %s2718_s24 = smov 128   ;;  %s2719_s6 = smov 8  }
 0x562   : > { %2350 = dma.vmem_to_hbm [thread:$0]  (%p2816_p3), %s1976_s29, 1024, %s1978_s30, %s1963_s5, %s2718_s24, %s2718_s24, %s2719_s6  }
 0x563 PF: > { %p2372_p11 = scmp.ge.s32.totalorder %s2706_s18, 2  ;;  %s1992_s7 = sand.u32 1, %s2694_s15  }
 0x564   : > { %s1993_s8 = scalar_lea.sflag [#allocation4], %s1992_s7 }
 0x565   : > { %p2364_p12 = pnand %p2372_p11, %p2780_p6 }
 0x567   : > { %p2365_p13 = pneg %p2364_p12 }
 0x569   : > { %2689 = dma.done.wait (%p2365_p13), %s1993_s8, 1024  }
 0x56a   : > { %2691 = vsyncadd (%p2365_p13), %s1993_s8, 4294966272  ;;  %p18_p0 = scmp.ge.s32.totalorder %s2803_s12, 10   ;;  %s3554_s15 = smov %s2698_s16 }
 0x56b   : > { %s3555_s16 = smov %s2702_s17  ;;  %s3556_s17 = smov %s2812_s20 }
 0x56c   : > { %s3557_s18 = smov %s2803_s12  ;;  %20 = sbr.rel (!%p18_p0) target bundleno = 6 (0x6), region = 89 }
 0x571   :  { %1999 = vsyncpa [#allocation3], 1 }
 0x572   :  { %2001 = vsyncpa [#allocation3 + $0x1], 1 }
 0x573   :  { %2002 = vsyncpa [#allocation6], 1 }
 0x574   :  { %2003 = vsyncpa [#allocation4], 1 }
 0x575   :  { %2005 = vsyncpa [#allocation4 + $0x1], 1 }

</bundles_post_ra>
